<compile_context>
chip_gen: v7x
topology: tpu7x:2x2x1
jax: 0.10.0
libtpu: 0.0.40
codegen_flags: <defaults>
</compile_context>

<pallas_src>
import functools

import jax
import jax.numpy as jnp
from jax.experimental import pallas as pl
from jax.experimental.pallas import tpu as pltpu


# ---------------------------------------------------------------------------
# Kernel body: two dense, lane-aligned GEMMs + one add, lane-dense store.
# (Per the review: the body is already MXU-push + VPU-add with idle EUP/XLU;
#  all the leverage is in grid-step count, prep hoisting and DMA width.)
# ---------------------------------------------------------------------------
def input_embeddings_kernel(patches_ref, wc_ref, wl_ref, add_ref, out_ref):
    # patches_ref: (C*p*p, Bb*n*n)  this block's patches, batch folded into lanes
    # wc_ref:      (Sp, C*p*p)      conv weight; row 0 zero (cls slot), rows >= S zero (pad)
    # wl_ref:      (Bb*n*n, Bb*E)   block-diagonal kron(I_Bb, W_lin^T)
    # add_ref:     (Sp, Bb*E)       pos_embed + cls + folded conv/linear biases (tiled Bb x)
    # out_ref:     (Sp, Bb*E)       lane-dense output slab
    conv = jnp.dot(wc_ref[...], patches_ref[...], preferred_element_type=jnp.float32)
    y = jnp.dot(conv, wl_ref[...], preferred_element_type=jnp.float32)
    out_ref[...] = (y + add_ref[...]).astype(out_ref.dtype)


# ---------------------------------------------------------------------------
# Hardware probe (best-effort, safe fallbacks): VMEM capacity + TC count.
# ---------------------------------------------------------------------------
@functools.lru_cache(maxsize=None)
def _tpu_hw_info():
    vmem = 64 << 20          # conservative default: v7x per-TC VMEM
    multi_tc = False
    try:
        info = pltpu.get_tpu_info()
        vmem = int(getattr(info, "vmem_capacity_bytes", vmem))
        for attr in ("tensorcore_count", "num_tensorcores", "num_cores", "core_count"):
            v = getattr(info, attr, None)
            if isinstance(v, int) and v > 1:
                multi_tc = True
                break
    except Exception:
        pass
    try:
        kind = jax.devices()[0].device_kind.lower()
        if ("v7" in kind) or ("tpu7" in kind):   # v7x: 2 TensorCores per chip
            multi_tc = True
    except Exception:
        pass
    return vmem, multi_tc


def _vmem_bytes_per_step(Bb, nn_, E, cpp, seq_pad, itemsize):
    """Per-step VMEM estimate (wl_bd is the only term that grows ~ Bb^2)."""
    patches = 2 * cpp * Bb * nn_ * itemsize      # pipelined input (double-buffered)
    wc = seq_pad * cpp * itemsize                # grid-invariant (single-buffered)
    wl = (Bb * nn_) * (Bb * E) * 4               # grid-invariant, f32
    add = seq_pad * Bb * E * 4                   # grid-invariant
    out = 2 * seq_pad * Bb * E * 4               # pipelined output (double-buffered)
    return patches + wc + wl + add + out


def _pick_batch_block(B, nn_, E, cpp, seq_pad, itemsize, vmem_budget, prefer_multi_step):
    """Pick Bb (images per grid step), generation-aware.

    Lane-safe: blocked lane dims (Bb*nn_, Bb*E) are multiples of 128, or the block spans
    the full array (Bb == B).  Among lane-safe divisors of B that fit the VMEM budget:
      * multi-TC chips (v7x): largest Bb keeping an even number of >= 2 grid steps;
      * single-TC chips (v5e/v6e): the grid is a serial loop, so take the largest Bb
        (ideally Bb == B, grid = 1) — fewer steps = less fixed per-step overhead.
    """
    def lane_safe(d):
        return d == B or ((d * nn_) % 128 == 0 and (d * E) % 128 == 0)

    divs = [d for d in range(1, B + 1) if B % d == 0]
    safe = [d for d in divs if lane_safe(d)] or [B]
    fits = [d for d in safe if _vmem_bytes_per_step(d, nn_, E, cpp, seq_pad, itemsize)
            <= vmem_budget]
    if not fits:
        return min(safe)     # smallest footprint fallback (tiny shapes never hit this)

    if prefer_multi_step:
        multi = [d for d in fits if (B // d) >= 2 and (B // d) % 2 == 0]
        if multi:
            return max(multi)
    return max(fits)


# ---------------------------------------------------------------------------
# Weight-side preprocessing — hoisted out of the per-forward path (run once).
# ---------------------------------------------------------------------------
def prepare_input_embeddings(w_conv, b_conv, w_lin, b_lin, cls_token, pos_table,
                             patch_dim, image_size, batch_size,
                             compute_dtype=jnp.float32, batch_block=None):
    p = patch_dim
    assert image_size % p == 0, "image_size must be divisible by patch_dim"
    n = image_size // p
    nn_ = n * n                                  # number_of_patches
    OC, C = int(w_conv.shape[0]), int(w_conv.shape[1])
    E = int(w_lin.shape[0])
    cpp = C * p * p
    seq_len = nn_ + 1
    seq_pad = ((seq_len + 7) // 8) * 8           # pad sublanes -> unmasked full-vreg stores

    # Implicit constraints of the PyTorch module — fail loudly, not at a matmul error.
    assert w_lin.shape[1] == nn_, (
        f"Linear in_features ({w_lin.shape[1]}) must equal number_of_patches ({nn_})")
    assert OC == nn_, (
        f"Conv out_channels ({OC}) must equal number_of_patches ({nn_}) for the pos-embed add")
    assert cls_token.shape == (1, E) and pos_table.shape == (seq_len, E)

    vmem_cap, multi_tc = _tpu_hw_info()
    itemsize = jnp.dtype(compute_dtype).itemsize
    Bb = (batch_block if batch_block is not None else
          _pick_batch_block(batch_size, nn_, E, cpp, seq_pad, itemsize,
                            vmem_budget=int(0.6 * vmem_cap),
                            prefer_multi_step=multi_tc))
    assert batch_size % Bb == 0

    # Conv weight flattened channel-major; row 0 is zero (cls slot), rows >= S are zero pad.
    wc_pad = jnp.zeros((seq_pad, cpp), jnp.float32)
    wc_pad = wc_pad.at[1:seq_len].set(w_conv.reshape(OC, cpp).astype(jnp.float32))
    wc_pad = wc_pad.astype(compute_dtype)

    # Block-diagonal Linear weight: one GEMM serves all Bb images with zero in-kernel
    # reshapes/transposes.  Extra zero-MACs are negligible at these sizes.
    wl_t = w_lin.astype(jnp.float32).T                                     # (n*n, E)
    wl_bd = jnp.kron(jnp.eye(Bb, dtype=jnp.float32), wl_t)                 # (Bb*n*n, Bb*E)

    # Fold the conv bias through the Linear and merge with linear bias / cls / pos_embed:
    #   (conv + b_conv[:,None]) @ wl_t = conv @ wl_t + outer(b_conv, colsum(wl_t))
    bias_rows = b_lin[None, :] + b_conv[:, None] * jnp.sum(wl_t, axis=0)[None, :]   # (OC, E)
    add_term = pos_table.astype(jnp.float32) + jnp.concatenate(
        [cls_token.astype(jnp.float32), bias_rows], axis=0)                          # (S, E)
    add_pad = jnp.zeros((seq_pad, E), jnp.float32).at[:seq_len].set(add_term)
    add_bd = jnp.tile(add_pad, (1, Bb))                                              # (Sp, Bb*E)

    needed = _vmem_bytes_per_step(Bb, nn_, E, cpp, seq_pad, itemsize)
    vmem_limit = int(min(int(0.9 * vmem_cap), max(32 << 20, int(1.5 * needed))))

    return dict(wc_pad=wc_pad, wl_bd=wl_bd, add_bd=add_bd,
                patch_dim=p, n=n, nn_=nn_, cpp=cpp, E=E,
                seq_len=seq_len, seq_pad=seq_pad,
                batch_size=batch_size, Bb=Bb,
                compute_dtype=compute_dtype, vmem_limit=vmem_limit)


# ---------------------------------------------------------------------------
# pallas_call builder with single-buffered grid-invariant operands (+ fallback).
# ---------------------------------------------------------------------------
_SINGLE_BUFFER_OK = True   # flipped to False once if pl.Buffered(1) is rejected


def _build_call(params, n_blk, B, single_buffer):
    seq_pad, Bb = params["seq_pad"], params["Bb"]
    nn_, cpp, E = params["nn_"], params["cpp"], params["E"]

    def const_spec(shape):
        # Grid-invariant operands: a second pipeline buffer is useless; single-buffer them.
        if single_buffer:
            return pl.BlockSpec(shape, lambda b: (0, 0), pipeline_mode=pl.Buffered(1))
        return pl.BlockSpec(shape, lambda b: (0, 0))

    return pl.pallas_call(
        input_embeddings_kernel,
        out_shape=jax.ShapeDtypeStruct((seq_pad, B * E), jnp.float32),
        grid=(n_blk,),
        in_specs=[
            pl.BlockSpec((cpp, Bb * nn_), lambda b: (0, b)),   # patches: slide over batch
            const_spec((seq_pad, cpp)),                         # conv weight (resident)
            const_spec((Bb * nn_, Bb * E)),                     # block-diag linear weight
            const_spec((seq_pad, Bb * E)),                      # additive term (resident)
        ],
        out_specs=pl.BlockSpec((seq_pad, Bb * E), lambda b: (0, b)),
        compiler_params=pltpu.CompilerParams(
            dimension_semantics=("parallel",),
            vmem_limit_bytes=params["vmem_limit"]),
    )


def _pallas_slab(patches2d, params, n_blk, B):
    global _SINGLE_BUFFER_OK
    args = (patches2d, params["wc_pad"], params["wl_bd"], params["add_bd"])
    if _SINGLE_BUFFER_OK:
        try:
            return _build_call(params, n_blk, B, single_buffer=True)(*args)
        except Exception:
            _SINGLE_BUFFER_OK = False   # older Pallas without pipeline_mode / Buffered(1)
    return _build_call(params, n_blk, B, single_buffer=False)(*args)


# ---------------------------------------------------------------------------
# Forward: only data-dependent glue + the kernel.  (Not jitted here so the
# Buffered(1) fallback above can trigger; jit after the first call if desired.)
# ---------------------------------------------------------------------------
def input_embeddings_forward(x, params):
    p, n, nn_, cpp, E = (params[k] for k in ("patch_dim", "n", "nn_", "cpp", "E"))
    seq_len, Bb = params["seq_len"], params["Bb"]
    B, C, H, W = x.shape
    assert B == params["batch_size"], "batch size must match prepare_input_embeddings"
    assert H == W == n * p
    n_blk = B // Bb

    # patches2d[c*p*p + ki*p + kj, b*n*n + i*n + j] = x[b, c, i*p + ki, j*p + kj]
    patches2d = (x.reshape(B, C, n, p, n, p)
                  .transpose(1, 3, 5, 0, 2, 4)
                  .reshape(cpp, B * nn_)).astype(params["compute_dtype"])

    out_slab = _pallas_slab(patches2d, params, n_blk, B)

    # (Sp, B*E) lane-dense slab -> (B, S, E) to match the PyTorch module's layout.
    # TODO(synk): downstream consumers that accept (S, B, E) / the raw slab should skip this
    #             transpose — it rewrites the whole output through HBM.
    return out_slab[:seq_len].reshape(seq_len, B, E).transpose(1, 0, 2)


# ---------------------------------------------------------------------------
# Pure-JAX mirror of the PyTorch forward (for correctness checks).
# ---------------------------------------------------------------------------
def reference(x, w_conv, b_conv, w_lin, b_lin, cls_token, pos_table, patch_dim):
    B, C, H, W = x.shape
    p = patch_dim
    n = H // p
    OC = w_conv.shape[0]
    E = w_lin.shape[0]
    conv = jax.lax.conv_general_dilated(
        x, w_conv, window_strides=(p, p), padding="VALID",
        dimension_numbers=("NCHW", "OIHW", "NCHW")) + b_conv[None, :, None, None]
    flat = conv.reshape(B, OC, n * n)                          # Flatten(start_dim=2)
    lin = jnp.einsum("bcl,el->bce", flat, w_lin) + b_lin       # Linear on last dim
    cls = jnp.broadcast_to(cls_token[None], (B, 1, E))
    return jnp.concatenate([cls, lin], axis=1) + pos_table[None]


if __name__ == "__main__":
    # Shapes consistent with the module's implicit constraints:
    #   (image_size // patch_dim)**2 == patch_dim*patch_dim   (Linear in_features)
    #   out_channels == number_of_patches                     (pos-embed broadcast add)
    input_channels, patch_dim, image_size = 4, 4, 16
    n_patches = (image_size // patch_dim) ** 2                # 16
    out_channels = n_patches                                  # 16
    embedding_dim = 32

    key = jax.random.PRNGKey(0)
    ks = jax.random.split(key, 7)
    w_conv = 0.05 * jax.random.normal(
        ks[1], (out_channels, input_channels, patch_dim, patch_dim), jnp.float32)
    b_conv = 0.05 * jax.random.normal(ks[2], (out_channels,), jnp.float32)
    w_lin = 0.05 * jax.random.normal(ks[3], (embedding_dim, patch_dim * patch_dim), jnp.float32)
    b_lin = 0.05 * jax.random.normal(ks[4], (embedding_dim,), jnp.float32)
    cls_token = 0.05 * jax.random.normal(ks[5], (1, embedding_dim), jnp.float32)
    pos_table = 0.05 * jax.random.normal(ks[6], (n_patches + 1, embedding_dim), jnp.float32)

    # B=16: single-TC chips take grid=1 (Bb=16); v7x takes Bb=8 (2 even, parallel steps).
    # B=2 : full-extent blocks (grid=1) — tiny masked-store fallback, documented.
    for B in (16, 2):
        x = jax.random.normal(jax.random.fold_in(ks[0], B),
                              (B, input_channels, image_size, image_size), jnp.float32)
        params = prepare_input_embeddings(w_conv, b_conv, w_lin, b_lin, cls_token, pos_table,
                                          patch_dim, image_size, batch_size=B)
        out = jax.block_until_ready(input_embeddings_forward(x, params))
        ref = reference(x, w_conv, b_conv, w_lin, b_lin, cls_token, pos_table, patch_dim)
        assert out.shape == (B, n_patches + 1, embedding_dim)
        assert jnp.allclose(out, ref, rtol=1e-5, atol=1e-5), float(jnp.abs(out - ref).max())

    # bf16 fast path: halves the dominant patch-slab DMA, keeps f32 MXU accumulation.
    B = 16
    x = jax.random.normal(jax.random.fold_in(ks[0], B),
                          (B, input_channels, image_size, image_size), jnp.float32)
    params_bf16 = prepare_input_embeddings(w_conv, b_conv, w_lin, b_lin, cls_token, pos_table,
                                           patch_dim, image_size, batch_size=B,
                                           compute_dtype=jnp.bfloat16)
    out_bf = jax.block_until_ready(input_embeddings_forward(x, params_bf16))
    ref = reference(x, w_conv, b_conv, w_lin, b_lin, cls_token, pos_table, patch_dim)
    assert jnp.allclose(out_bf, ref, rtol=5e-2, atol=5e-2), float(jnp.abs(out_bf - ref).max())

    print("KERNEL_OK")
</pallas_src>

<mosaic_0001>
module attributes {stable_mosaic.version = 11 : i64} {
  func.func @input_embeddings_kernel(%arg0: i32, %arg1: memref<64x256xf32, #tpu.memory_space<vmem>>, %arg2: memref<24x64xf32, #tpu.memory_space<vmem>>, %arg3: memref<256x512xf32, #tpu.memory_space<vmem>>, %arg4: memref<24x512xf32, #tpu.memory_space<vmem>>, %arg5: memref<24x512xf32, #tpu.memory_space<vmem>>) attributes {dimension_semantics = [#tpu.dimension_semantics<parallel>], iteration_bounds = array<i64: 1>, scalar_prefetch = 0 : i64, scratch_operands = 0 : i64, tpu.core_type = #tpu.core_type<tc>, window_params = [{transform_indices = @transform_0, window_bounds = array<i64: 64, 256>}, {pipeline_mode = #tpu.pipeline_mode<synchronous>, transform_indices = @transform_1, window_bounds = array<i64: 24, 64>}, {pipeline_mode = #tpu.pipeline_mode<synchronous>, transform_indices = @transform_2, window_bounds = array<i64: 256, 512>}, {pipeline_mode = #tpu.pipeline_mode<synchronous>, transform_indices = @transform_3, window_bounds = array<i64: 24, 512>}, {transform_indices = @transform_4, window_bounds = array<i64: 24, 512>}]} {
    %c0 = arith.constant 0 : index
    %c0_0 = arith.constant 0 : index
    %0 = vector.load %arg2[%c0, %c0_0] : memref<24x64xf32, #tpu.memory_space<vmem>>, vector<24x64xf32>
    %c0_1 = arith.constant 0 : index
    %c0_2 = arith.constant 0 : index
    %1 = vector.load %arg1[%c0_1, %c0_2] : memref<64x256xf32, #tpu.memory_space<vmem>>, vector<64x256xf32>
    %cst = arith.constant dense<0.000000e+00> : vector<24x256xf32>
    %2 = tpu.matmul %0, %1, %cst {dimension_numbers = #tpu.dot_dimension_numbers<[1], [0], [0], [1], [0, 0, 1, 1], [], []>} : vector<24x64xf32>, vector<64x256xf32>, vector<24x256xf32> -> vector<24x256xf32>
    %c0_3 = arith.constant 0 : index
    %c0_4 = arith.constant 0 : index
    %3 = vector.load %arg3[%c0_3, %c0_4] : memref<256x512xf32, #tpu.memory_space<vmem>>, vector<256x512xf32>
    %cst_5 = arith.constant dense<0.000000e+00> : vector<24x512xf32>
    %4 = tpu.matmul %2, %3, %cst_5 {dimension_numbers = #tpu.dot_dimension_numbers<[1], [0], [0], [1], [0, 0, 1, 1], [], []>} : vector<24x256xf32>, vector<256x512xf32>, vector<24x512xf32> -> vector<24x512xf32>
    %c0_6 = arith.constant 0 : index
    %c0_7 = arith.constant 0 : index
    %5 = vector.load %arg4[%c0_6, %c0_7] : memref<24x512xf32, #tpu.memory_space<vmem>>, vector<24x512xf32>
    %6 = arith.addf %4, %5 : vector<24x512xf32>
    %c0_8 = arith.constant 0 : index
    %c0_9 = arith.constant 0 : index
    %7 = vector.load %arg5[%c0_8, %c0_9] : memref<24x512xf32, #tpu.memory_space<vmem>>, vector<24x512xf32>
    tpu.vector_store %arg5[%c0_8, %c0_9], %6 {strides = array<i32>} : memref<24x512xf32, #tpu.memory_space<vmem>>, vector<24x512xf32>,
    return
  }
  func.func @transform_0(%arg0: i32) -> (i32, i32) {
    %c0_i32 = arith.constant 0 : i32
    %c0_i32_0 = arith.constant 0 : i32
    return %c0_i32, %arg0 : i32, i32
  }
  func.func @transform_1(%arg0: i32) -> (i32, i32) {
    %c0_i32 = arith.constant 0 : i32
    %c0_i32_0 = arith.constant 0 : i32
    %c0_i32_1 = arith.constant 0 : i32
    return %c0_i32, %c0_i32_0 : i32, i32
  }
  func.func @transform_2(%arg0: i32) -> (i32, i32) {
    %c0_i32 = arith.constant 0 : i32
    %c0_i32_0 = arith.constant 0 : i32
    %c0_i32_1 = arith.constant 0 : i32
    return %c0_i32, %c0_i32_0 : i32, i32
  }
  func.func @transform_3(%arg0: i32) -> (i32, i32) {
    %c0_i32 = arith.constant 0 : i32
    %c0_i32_0 = arith.constant 0 : i32
    %c0_i32_1 = arith.constant 0 : i32
    return %c0_i32, %c0_i32_0 : i32, i32
  }
  func.func @transform_4(%arg0: i32) -> (i32, i32) {
    %c0_i32 = arith.constant 0 : i32
    %c0_i32_0 = arith.constant 0 : i32
    return %c0_i32, %arg0 : i32, i32
  }
}

module attributes {stable_mosaic.version = 11 : i64} {
  func.func @input_embeddings_kernel(%arg0: i32, %arg1: memref<64x256xf32, #tpu.memory_space<vmem>>, %arg2: memref<24x64xf32, #tpu.memory_space<vmem>>, %arg3: memref<256x512xf32, #tpu.memory_space<vmem>>, %arg4: memref<24x512xf32, #tpu.memory_space<vmem>>, %arg5: memref<24x512xf32, #tpu.memory_space<vmem>>) attributes {dimension_semantics = [#tpu.dimension_semantics<parallel>], iteration_bounds = array<i64: 1>, scalar_prefetch = 0 : i64, scratch_operands = 0 : i64, tpu.core_type = #tpu.core_type<tc>, window_params = [{transform_indices = @transform_0, window_bounds = array<i64: 64, 256>}, {pipeline_mode = #tpu.pipeline_mode<synchronous>, transform_indices = @transform_1, window_bounds = array<i64: 24, 64>}, {pipeline_mode = #tpu.pipeline_mode<synchronous>, transform_indices = @transform_2, window_bounds = array<i64: 256, 512>}, {pipeline_mode = #tpu.pipeline_mode<synchronous>, transform_indices = @transform_3, window_bounds = array<i64: 24, 512>}, {transform_indices = @transform_4, window_bounds = array<i64: 24, 512>}]} {
    %c0 = arith.constant 0 : index
    %c0_0 = arith.constant 0 : index
    %0 = vector.load %arg2[%c0, %c0_0] : memref<24x64xf32, #tpu.memory_space<vmem>>, vector<24x64xf32>
    %c0_1 = arith.constant 0 : index
    %c0_2 = arith.constant 0 : index
    %1 = vector.load %arg1[%c0_1, %c0_2] : memref<64x256xf32, #tpu.memory_space<vmem>>, vector<64x256xf32>
    %cst = arith.constant dense<0.000000e+00> : vector<24x256xf32>
    %2 = tpu.matmul %0, %1, %cst {dimension_numbers = #tpu.dot_dimension_numbers<[1], [0], [0], [1], [0, 0, 1, 1], [], []>} : vector<24x64xf32>, vector<64x256xf32>, vector<24x256xf32> -> vector<24x256xf32>
    %c0_3 = arith.constant 0 : index
    %c0_4 = arith.constant 0 : index
    %3 = vector.load %arg3[%c0_3, %c0_4] : memref<256x512xf32, #tpu.memory_space<vmem>>, vector<256x512xf32>
    %cst_5 = arith.constant dense<0.000000e+00> : vector<24x512xf32>
    %4 = tpu.matmul %2, %3, %cst_5 {dimension_numbers = #tpu.dot_dimension_numbers<[1], [0], [0], [1], [0, 0, 1, 1], [], []>} : vector<24x256xf32>, vector<256x512xf32>, vector<24x512xf32> -> vector<24x512xf32>
    %c0_6 = arith.constant 0 : index
    %c0_7 = arith.constant 0 : index
    %5 = vector.load %arg4[%c0_6, %c0_7] : memref<24x512xf32, #tpu.memory_space<vmem>>, vector<24x512xf32>
    %6 = arith.addf %4, %5 : vector<24x512xf32>
    %c0_8 = arith.constant 0 : index
    %c0_9 = arith.constant 0 : index
    %7 = vector.load %arg5[%c0_8, %c0_9] : memref<24x512xf32, #tpu.memory_space<vmem>>, vector<24x512xf32>
    tpu.vector_store %arg5[%c0_8, %c0_9], %6 {strides = array<i32>} : memref<24x512xf32, #tpu.memory_space<vmem>>, vector<24x512xf32>,
    return
  }
  func.func @transform_0(%arg0: i32) -> (i32, i32) {
    %c0_i32 = arith.constant 0 : i32
    %c0_i32_0 = arith.constant 0 : i32
    return %c0_i32, %arg0 : i32, i32
  }
  func.func @transform_1(%arg0: i32) -> (i32, i32) {
    %c0_i32 = arith.constant 0 : i32
    %c0_i32_0 = arith.constant 0 : i32
    %c0_i32_1 = arith.constant 0 : i32
    return %c0_i32, %c0_i32_0 : i32, i32
  }
  func.func @transform_2(%arg0: i32) -> (i32, i32) {
    %c0_i32 = arith.constant 0 : i32
    %c0_i32_0 = arith.constant 0 : i32
    %c0_i32_1 = arith.constant 0 : i32
    return %c0_i32, %c0_i32_0 : i32, i32
  }
  func.func @transform_3(%arg0: i32) -> (i32, i32) {
    %c0_i32 = arith.constant 0 : i32
    %c0_i32_0 = arith.constant 0 : i32
    %c0_i32_1 = arith.constant 0 : i32
    return %c0_i32, %c0_i32_0 : i32, i32
  }
  func.func @transform_4(%arg0: i32) -> (i32, i32) {
    %c0_i32 = arith.constant 0 : i32
    %c0_i32_0 = arith.constant 0 : i32
    return %c0_i32, %arg0 : i32, i32
  }
}

</mosaic_0001>

<bundles_post_ra>
// kernel: tpu_custom_call.1
= control target key start
LH: loop header
LB: loop body
LE: loop exit
PB: predicated region body
PF: predicated region fallthrough
CT: control target
= control target key end

     0   :  { %9 = vsyncpa [#allocation3], 0  ;;  %s911_s0 = inlined_call_operand.hbm [shape: f32[64,256], index: 0, kind: input, shape index: {}]   ;;  %s912_s1 = inlined_call_operand.hbm [shape: f32[24,64], index: 1, kind: input, shape index: {}]   ;;  %s913_s2 = inlined_call_operand.hbm [shape: f32[256,512], index: 2, kind: input, shape index: {}]   ;;  %s914_s3 = inlined_call_operand.hbm [shape: f32[24,512], index: 3, kind: input, shape index: {}]   ;;  %s915_s4 = inlined_call_operand.hbm [shape: f32[24,512], index: 4, kind: output, shape index: {}]  }
   0x1   :  { %10 = vsyncpa [#allocation6], 0 }
   0x2   :  { %11 = vsyncpa [#allocation9], 0 }
   0x3   :  { %12 = vsyncpa [#allocation4], 0  ;;  %s799_s15 = smov [#allocation5]   ;;  %s681_s19 = scalar_lea.hbm %s912_s1, 384 }
   0x4   :  { %s30_s16 = sshll.u32 %s799_s15, 4  ;;  %p682_p0 = scmp.ne.s32.totalorder %s912_s1, %s681_s19  ;;  %s31_s16 = int_to_ptr.vmem [resolvable:$true] %s30_s16 }
   0x5   :  { %p685_p1 = scmp.lt.u32.totalorder %s681_s19, %s912_s1 }
   0x7   :  { %p687_p2 = pnand %p685_p1, %p682_p0 }
   0x9   :  { %690 = shalt.err (!%p687_p2)
}
   0xa   :  { %s691_s24 = scalar_lea.vmem %s31_s16, 384  ;;  %p696_p4 = scmp.lt.s32.totalorder %s31_s16, %s31_s16 }
   0xb   :  { %p692_p3 = scmp.ne.s32.totalorder %s31_s16, %s691_s24  ;;  %p697_p5 = scmp.lt.s32.totalorder %s691_s24, %s691_s24 }
   0xd   :  { %p698_p6 = por %p697_p5, %p696_p4 }
   0xf   :  { %p699_p7 = pnand %p698_p6, %p692_p3 }
  0x11   :  { %702 = shalt.err (!%p699_p7)
}
  0x12   :  { %s800_s25 = smov 128   ;;  %s801_s26 = smov 8  }
  0x13   :  { %36 = dma.hbm_to_vmem [thread:$0]  %s912_s1, 384, %s31_s16, [#allocation6], %s800_s25, %s800_s25, %s801_s26  }
  0x14   :  { %s802_s29 = smov [#allocation2]   ;;  %s703_s7 = scalar_lea.hbm %s911_s0, 2048 }
  0x15   :  { %s18_s30 = sshll.u32 %s802_s29, 4  ;;  %p704_p8 = scmp.ne.s32.totalorder %s911_s0, %s703_s7  ;;  %s19_s30 = int_to_ptr.vmem [resolvable:$true] %s18_s30 }
  0x16   :  { %p707_p9 = scmp.lt.u32.totalorder %s703_s7, %s911_s0 }
  0x18   :  { %p709_p10 = pnand %p707_p9, %p704_p8 }
  0x1a   :  { %712 = shalt.err (!%p709_p10)
}
  0x1b   :  { %s713_s12 = scalar_lea.vmem %s19_s30, 2048  ;;  %p718_p12 = scmp.lt.s32.totalorder %s19_s30, %s19_s30 }
  0x1c   :  { %p714_p11 = scmp.ne.s32.totalorder %s19_s30, %s713_s12  ;;  %p719_p13 = scmp.lt.s32.totalorder %s713_s12, %s713_s12 }
  0x1e   :  { %p720_p0 = por %p719_p13, %p718_p12 }
  0x20   :  { %p721_p1 = pnand %p720_p0, %p714_p11 }
  0x22   :  { %724 = shalt.err (!%p721_p1)
}
  0x23   :  { %s803_s1 = smov 256   ;;  %s804_s13 = smov 16  }
  0x24   :  { %24 = dma.hbm_to_vmem [thread:$0]  %s911_s0, 2048, %s19_s30, [#allocation3], %s803_s1, %s803_s1, %s804_s13  }
  0x25   :  { %s805_s16 = smov [#allocation7]   ;;  %s725_s20 = scalar_lea.hbm %s913_s2, 16384 }
  0x26   :  { %s42_s17 = sshll.u32 %s805_s16, 4  ;;  %p726_p2 = scmp.ne.s32.totalorder %s913_s2, %s725_s20  ;;  %s43_s17 = int_to_ptr.vmem [resolvable:$true] %s42_s17 }
  0x27   :  { %p729_p3 = scmp.lt.u32.totalorder %s725_s20, %s913_s2 }
  0x29   :  { %p731_p4 = pnand %p729_p3, %p726_p2 }
  0x2b   :  { %734 = shalt.err (!%p731_p4)
}
  0x2c   :  { %s735_s25 = scalar_lea.vmem %s43_s17, 16384  ;;  %p740_p6 = scmp.lt.s32.totalorder %s43_s17, %s43_s17 }
  0x2d   :  { %p736_p5 = scmp.ne.s32.totalorder %s43_s17, %s735_s25  ;;  %p741_p7 = scmp.lt.s32.totalorder %s735_s25, %s735_s25 }
  0x2f   :  { %p742_p8 = por %p741_p7, %p740_p6 }
  0x31   :  { %p743_p9 = pnand %p742_p8, %p736_p5 }
  0x33   :  { %746 = shalt.err (!%p743_p9)
}
  0x34   :  { %s806_s0 = smov 512   ;;  %s807_s26 = smov 32  }
  0x35   :  { %48 = dma.hbm_to_vmem [thread:$0]  %s913_s2, 16384, %s43_s17, [#allocation6], %s806_s0, %s806_s0, %s807_s26  }
  0x36   :  { %s808_s29 = smov [#allocation8]   ;;  %s747_s7 = scalar_lea.hbm %s914_s3, 1536 }
  0x37   :  { %s54_s30 = sshll.u32 %s808_s29, 4  ;;  %p748_p10 = scmp.ne.s32.totalorder %s914_s3, %s747_s7  ;;  %s55_s30 = int_to_ptr.vmem [resolvable:$true] %s54_s30 }
  0x38   :  { %p751_p11 = scmp.lt.u32.totalorder %s747_s7, %s914_s3 }
  0x3a   :  { %p753_p12 = pnand %p751_p11, %p748_p10 }
  0x3c   :  { %756 = shalt.err (!%p753_p12)
}
  0x3d   :  { %s757_s12 = scalar_lea.vmem %s55_s30, 1536  ;;  %p762_p0 = scmp.lt.s32.totalorder %s55_s30, %s55_s30 }
  0x3e   :  { %p758_p13 = scmp.ne.s32.totalorder %s55_s30, %s757_s12  ;;  %p763_p1 = scmp.lt.s32.totalorder %s757_s12, %s757_s12 }
  0x40   :  { %p764_p2 = por %p763_p1, %p762_p0 }
  0x42   :  { %p765_p3 = pnand %p764_p2, %p758_p13 }
  0x44   :  { %768 = shalt.err (!%p765_p3)
}
  0x45   :  { %60 = dma.hbm_to_vmem [thread:$0]  %s914_s3, 1536, %s55_s30, [#allocation9], %s806_s0, %s806_s0, %s807_s26  }
  0x46   :  { %791 = dma.done.wait [#allocation3], 2048  }
  0x47   :  { %792 = vsyncadd [#allocation3], 4294965248 }
  0x48   :  { %793 = dma.done.wait [#allocation6], 16768  }
  0x49   :  { %794 = vsyncadd [#allocation6], 4294950528 }
  0x4a   :  { %795 = dma.done.wait [#allocation9], 1536  }
  0x4b   :  { %796 = vsyncadd [#allocation9], 4294965760  ;;  %v809_v0 = vmov 0.0   ;;  %v77_v1 = vld [vmem:[#allocation2 + $0x8] sm:$0xff]  ;;  %v79_v2 = vld [vmem:[#allocation2 + $0x18] sm:$0xff]  ;;  %vm92_vm0 = vcmask 523264  }
  0x4c   :  { %166 = vmatprep.mubr.f32.mxu0 %v809_v0  ;;  %v76_v3 = vld [vmem:[#allocation2] sm:$0xff]  ;;  %v525_v4 = vpack.c.bf16 %v79_v2, %v77_v1  ;;  %v78_v5 = vld [vmem:[#allocation2 + $0x10] sm:$0xff]  ;;  %v81_v6 = vld [vmem:[#allocation2 + $0x28] sm:$0xff]  ;;  %s810_s3 = smov [#allocation10]  }
  0x4d   :  { %v83_v7 = vld [vmem:[#allocation2 + $0x38] sm:$0xff]  ;;  %v527_v8 = vpack.c.bf16 %v78_v5, %v76_v3  ;;  %v80_v10 = vld [vmem:[#allocation2 + $0x20] sm:$0xff]  ;;  %v82_v11 = vld [vmem:[#allocation2 + $0x30] sm:$0xff]  ;;  %s508_s13 = sshll.u32 %s810_s3, 4  ;;  %s509_s13 = int_to_ptr.vmem [resolvable:$true] %s508_s13 }
  0x4e   :  { %v529_v9 = vpack.c.bf16 %v83_v7, %v81_v6  ;;  %v85_v12 = vld [vmem:[#allocation2 + $0x48] sm:$0xff]  ;;  %526 = vmatprep.subr.bf16.mxu0 %v525_v4  ;;  %v87_v13 = vld [vmem:[#allocation2 + $0x58] sm:$0xff]  ;;  %v531_v14 = vpack.c.bf16 %v82_v11, %v80_v10  ;;  %v84_v16 = vld [vmem:[#allocation2 + $0x40] sm:$0xff]  ;;  %s769_s14 = scalar_lea.vmem %s509_s13, 1536  ;;  %p774_p5 = scmp.lt.s32.totalorder %s509_s13, %s509_s13 }
  0x4f   :  { %528 = vmatpush1.bf16.msra.mxu0 %v527_v8  ;;  %v533_v15 = vpack.c.bf16 %v87_v13, %v85_v12  ;;  %v86_v17 = vld [vmem:[#allocation2 + $0x50] sm:$0xff]  ;;  %v89_v18 = vld [vmem:[#allocation2 + $0x68] sm:$0xff]  ;;  %v91_v19 = vld [vmem:[#allocation2 + $0x78] sm:$0xff]  ;;  %p770_p4 = scmp.ne.s32.totalorder %s509_s13, %s769_s14  ;;  %p775_p6 = scmp.lt.s32.totalorder %s769_s14, %s769_s14 }
  0x50   :  { %530 = vmatprep.subr.bf16.mxu0 %v529_v9  ;;  %v186_v20 = vld [vmem:[#allocation7 + $0x8] sm:$0xff]  ;;  %v185_v23 = vld [vmem:[#allocation7] sm:$0xff]  ;;  %v535_v24 = vpack.c.bf16 %v86_v17, %v84_v16  ;;  %v90_v26 = vld [vmem:[#allocation2 + $0x70] sm:$0xff]  ;;  %v537_v28 = vpack.c.bf16 %v91_v19, %v89_v18 }
  0x51   :  { %v190_v21 = vld [vmem:[#allocation7 + $0x28] sm:$0xff]  ;;  %v189_v27 = vld [vmem:[#allocation7 + $0x20] sm:$0xff]  ;;  %v188_v29 = vld [vmem:[#allocation7 + $0x18] sm:$0xff]  ;;  %p776_p7 = por %p775_p6, %p774_p5 }
  0x52   :  { %v541_v22 = vpack.c.bf16 %v190_v21, %v186_v20  ;;  %v88_v25 = vld [vmem:[#allocation2 + $0x60] sm:$0xff]  ;;  %v543_v30 = vpack.c.bf16 %v189_v27, %v185_v23  ;;  %v192_v33 = vld [vmem:[#allocation7 + $0x38] sm:$0xff]  ;;  %v193_v35 = vld [vmem:[#allocation7 + $0x40] sm:$0xff] }
  0x53   :  { %532 = vmatpush1.bf16.msra.mxu0 %v531_v14  ;;  %v194_v31 = vld [vmem:[#allocation7 + $0x48] sm:$0xff]  ;;  %v197_v36 = vld [vmem:[#allocation7 + $0x60] sm:$0xff]  ;;  %v539_v39 = vpack.c.bf16 %v90_v26, %v88_v25  ;;  %v187_v40 = vld [vmem:[#allocation7 + $0x10] sm:$0xff]  ;;  %v605_v43 = vpack.c.bf16 %v192_v33, %v188_v29  ;;  %p777_p8 = pnand %p776_p7, %p770_p4 }
  0x54   :  { %534 = vmatprep.subr.bf16.mxu0 %v533_v15  ;;  %542 = vmatprep.subr.bf16.mxu1 %v541_v22  ;;  %v198_v32 = vld [vmem:[#allocation7 + $0x68] sm:$0xff]  ;;  %v547_v37 = vpack.c.bf16 %v197_v36, %v193_v35  ;;  %v191_v41 = vld [vmem:[#allocation7 + $0x30] sm:$0xff]  ;;  %v196_v44 = vld [vmem:[#allocation7 + $0x58] sm:$0xff] }
  0x55   :  { %v545_v34 = vpack.c.bf16 %v198_v32, %v194_v31  ;;  %544 = vmatpush1.bf16.msra.mxu1 %v543_v30  ;;  %v202_v38 = vld [vmem:[#allocation7 + $0x88] sm:$0xff]  ;;  %v201_v46 = vld [vmem:[#allocation7 + $0x80] sm:$0xff]  ;;  %v200_v48 = vld [vmem:[#allocation7 + $0x78] sm:$0xff]  ;;  %v607_v53 = vpack.c.bf16 %v191_v41, %v187_v40 }
  0x56   :  { %v206_v42 = vld [vmem:[#allocation7 + $0xa8] sm:$0xff]  ;;  %v205_v47 = vld [vmem:[#allocation7 + $0xa0] sm:$0xff]  ;;  %v609_v56 = vpack.c.bf16 %v200_v48, %v196_v44  ;;  %v195_v57 = vld [vmem:[#allocation7 + $0x50] sm:$0xff] }
  0x57   :  { %536 = vmatpush1.bf16.msra.mxu0 %v535_v24  ;;  %546 = vmatprep.subr.bf16.mxu1 %v545_v34  ;;  %v549_v45 = vpack.c.bf16 %v206_v42, %v202_v38  ;;  %v210_v49 = vld [vmem:[#allocation7 + $0xc8] sm:$0xff]  ;;  %v551_v51 = vpack.c.bf16 %v205_v47, %v201_v46  ;;  %v209_v54 = vld [vmem:[#allocation7 + $0xc0] sm:$0xff]  ;;  %v199_v58 = vld [vmem:[#allocation7 + $0x70] sm:$0xff] }
  0x58   :  { %538 = vmatprep.subr.bf16.mxu0 %v537_v28  ;;  %v214_v50 = vld [vmem:[#allocation7 + $0xe8] sm:$0xff]  ;;  %v213_v55 = vld [vmem:[#allocation7 + $0xe0] sm:$0xff]  ;;  %v204_v59 = vld [vmem:[#allocation7 + $0x98] sm:$0xff]  ;;  %v611_v3 = vpack.c.bf16 %v199_v58, %v195_v57 }
  0x59   :  { %548 = vmatpush1.bf16.msra.mxu1 %v547_v37  ;;  %v73_v52 = vld [vmem:[#allocation5] sm:$0xff]  ;;  %v553_v60 = vpack.c.bf16 %v214_v50, %v210_v49  ;;  %v208_v61 = vld [vmem:[#allocation7 + $0xb8] sm:$0xff]  ;;  %v74_v1 = vld [vmem:[#allocation5 + $0x8] sm:$0xff]  ;;  %v555_v2 = vpack.c.bf16 %v213_v55, %v209_v54 }
  0x5a   :  { %550 = vmatprep.subr.bf16.mxu1 %v549_v45  ;;  %v218_v62 = vld [vmem:[#allocation7 + $0x108] sm:$0xff]  ;;  %v203_v4 = vld [vmem:[#allocation7 + $0x90] sm:$0xff]  ;;  %v217_v5 = vld [vmem:[#allocation7 + $0x100] sm:$0xff]  ;;  %v613_v7 = vpack.c.bf16 %v208_v61, %v204_v59 }
  0x5b   :  { %540 = vmatpush1.bf16.msra.mxu0 %v539_v39  ;;  %v222_v63 = vld [vmem:[#allocation7 + $0x128] sm:$0xff]  ;;  %v221_v6 = vld [vmem:[#allocation7 + $0x120] sm:$0xff]  ;;  %v207_v8 = vld [vmem:[#allocation7 + $0xb0] sm:$0xff] }
  0x5c   :  { %606 = vmatprep.subr.bf16.mxu0 %v605_v43  ;;  %v557_v9 = vpack.c.bf16 %v222_v63, %v218_v62  ;;  %v226_v10 = vld [vmem:[#allocation7 + $0x148] sm:$0xff]  ;;  %v212_v12 = vld [vmem:[#allocation7 + $0xd8] sm:$0xff]  ;;  %v559_v15 = vpack.c.bf16 %v221_v6, %v217_v5  ;;  %v615_v16 = vpack.c.bf16 %v207_v8, %v203_v4  ;;  %v211_v17 = vld [vmem:[#allocation7 + $0xd0] sm:$0xff] }
  0x5d   :  { %552 = vmatpush1.bf16.msra.mxu1 %v551_v51  ;;  %v230_v11 = vld [vmem:[#allocation7 + $0x168] sm:$0xff]  ;;  %v216_v13 = vld [vmem:[#allocation7 + $0xf8] sm:$0xff]  ;;  %v225_v19 = vld [vmem:[#allocation7 + $0x140] sm:$0xff] }
  0x5e   :  { %522 = vmatmul.mubr.msk.f32.vlgmr.msra.gmra.mrb[0].mxu0 %vm92_vm0, %v73_v52  ;;  %554 = vmatprep.subr.bf16.mxu1 %v553_v60  ;;  %v75_v14 = vld [vmem:[#allocation5 + $0x10] sm:$0xff]  ;;  %v561_v18 = vpack.c.bf16 %v230_v11, %v226_v10  ;;  %v229_v20 = vld [vmem:[#allocation7 + $0x160] sm:$0xff]  ;;  %v617_v21 = vpack.c.bf16 %v216_v13, %v212_v12  ;;  %v215_v22 = vld [vmem:[#allocation7 + $0xf0] sm:$0xff] }
  0x5f   :  { %172 = vmatprep.mubr.f32.mxu0 %v809_v0  ;;  %608 = vmatpush1.bf16.msra.mxu0 %v607_v53  ;;  %v234_v23 = vld [vmem:[#allocation7 + $0x188] sm:$0xff]  ;;  %v220_v25 = vld [vmem:[#allocation7 + $0x118] sm:$0xff]  ;;  %v563_v27 = vpack.c.bf16 %v229_v20, %v225_v19  ;;  %v219_v28 = vld [vmem:[#allocation7 + $0x110] sm:$0xff] }
  0x60   :  { %610 = vmatprep.subr.bf16.mxu0 %v609_v56  ;;  %v238_v24 = vld [vmem:[#allocation7 + $0x1a8] sm:$0xff]  ;;  %v224_v26 = vld [vmem:[#allocation7 + $0x138] sm:$0xff]  ;;  %v233_v30 = vld [vmem:[#allocation7 + $0x180] sm:$0xff] }
  0x61   :  { %556 = vmatpush1.bf16.msra.mxu1 %v555_v2  ;;  %v565_v29 = vpack.c.bf16 %v238_v24, %v234_v23  ;;  %v237_v31 = vld [vmem:[#allocation7 + $0x1a0] sm:$0xff]  ;;  %v621_v32 = vpack.c.bf16 %v224_v26, %v220_v25  ;;  %v223_v33 = vld [vmem:[#allocation7 + $0x130] sm:$0xff]  ;;  %v242_v34 = vld [vmem:[#allocation7 + $0x1c8] sm:$0xff] }
  0x62   :  { %523 = vmatmul.mubr.msk.f32.gmra.mrb[2].mxu0 %vm92_vm0, %v74_v1  ;;  %558 = vmatprep.subr.bf16.mxu1 %v557_v9  ;;  %v246_v35 = vld [vmem:[#allocation7 + $0x1e8] sm:$0xff]  ;;  %v228_v36 = vld [vmem:[#allocation7 + $0x158] sm:$0xff]  ;;  %v567_v38 = vpack.c.bf16 %v237_v31, %v233_v30  ;;  %v623_v39 = vpack.c.bf16 %v223_v33, %v219_v28  ;;  %v227_v40 = vld [vmem:[#allocation7 + $0x150] sm:$0xff] }
  0x63   :  { %178 = vmatprep.mubr.f32.mxu0 %v809_v0  ;;  %612 = vmatpush1.bf16.msra.mxu0 %v611_v3  ;;  %v619_v0 = vpack.c.bf16 %v215_v22, %v211_v17  ;;  %v232_v37 = vld [vmem:[#allocation7 + $0x178] sm:$0xff]  ;;  %v569_v41 = vpack.c.bf16 %v246_v35, %v242_v34  ;;  %v241_v42 = vld [vmem:[#allocation7 + $0x1c0] sm:$0xff]  ;;  %v231_v45 = vld [vmem:[#allocation7 + $0x170] sm:$0xff] }
  0x64   :  { %614 = vmatprep.subr.bf16.mxu0 %v613_v7  ;;  %v245_v43 = vld [vmem:[#allocation7 + $0x1e0] sm:$0xff]  ;;  %v625_v44 = vpack.c.bf16 %v232_v37, %v228_v36  ;;  %v250_v46 = vld [vmem:[#allocation7 + $0x208] sm:$0xff]  ;;  %v236_v48 = vld [vmem:[#allocation7 + $0x198] sm:$0xff]  ;;  %v627_v51 = vpack.c.bf16 %v231_v45, %v227_v40 }
  0x65   :  { %560 = vmatpush1.bf16.msra.mxu1 %v559_v15  ;;  %v254_v47 = vld [vmem:[#allocation7 + $0x228] sm:$0xff]  ;;  %v240_v49 = vld [vmem:[#allocation7 + $0x1b8] sm:$0xff]  ;;  %v571_v50 = vpack.c.bf16 %v245_v43, %v241_v42  ;;  %v235_v52 = vld [vmem:[#allocation7 + $0x190] sm:$0xff] }
  0x66   :  { %524 = vmatmul.mubr.msk.f32.gmra.mrb[4].mxu0 %vm92_vm0, %v75_v14  ;;  %562 = vmatprep.subr.bf16.mxu1 %v561_v18  ;;  %v573_v53 = vpack.c.bf16 %v254_v47, %v250_v46  ;;  %v249_v54 = vld [vmem:[#allocation7 + $0x200] sm:$0xff]  ;;  %v629_v56 = vpack.c.bf16 %v240_v49, %v236_v48  ;;  %v239_v57 = vld [vmem:[#allocation7 + $0x1b0] sm:$0xff]  ;;  %v258_v58 = vld [vmem:[#allocation7 + $0x248] sm:$0xff] }
  0x67   :  { %616 = vmatpush1.bf16.msra.mxu0 %v615_v16  ;;  %v253_v55 = vld [vmem:[#allocation7 + $0x220] sm:$0xff]  ;;  %v262_v59 = vld [vmem:[#allocation7 + $0x268] sm:$0xff]  ;;  %v244_v60 = vld [vmem:[#allocation7 + $0x1d8] sm:$0xff]  ;;  %v631_v63 = vpack.c.bf16 %v239_v57, %v235_v52 }
  0x68   :  { %618 = vmatprep.subr.bf16.mxu0 %v617_v21  ;;  %v248_v61 = vld [vmem:[#allocation7 + $0x1f8] sm:$0xff]  ;;  %v575_v62 = vpack.c.bf16 %v253_v55, %v249_v54  ;;  %v243_v1 = vld [vmem:[#allocation7 + $0x1d0] sm:$0xff]  ;;  %v577_v2 = vpack.c.bf16 %v262_v59, %v258_v58  ;;  %v257_v3 = vld [vmem:[#allocation7 + $0x240] sm:$0xff] }
  0x69   :  { %564 = vmatpush1.bf16.msra.mxu1 %v563_v27  ;;  %v261_v4 = vld [vmem:[#allocation7 + $0x260] sm:$0xff]  ;;  %v633_v5 = vpack.c.bf16 %v248_v61, %v244_v60  ;;  %v247_v6 = vld [vmem:[#allocation7 + $0x1f0] sm:$0xff]  ;;  %v266_v7 = vld [vmem:[#allocation7 + $0x288] sm:$0xff] }
  0x6a   :  { %566 = vmatprep.subr.bf16.mxu1 %v565_v29  ;;  %v270_v8 = vld [vmem:[#allocation7 + $0x2a8] sm:$0xff]  ;;  %v252_v9 = vld [vmem:[#allocation7 + $0x218] sm:$0xff]  ;;  %v579_v11 = vpack.c.bf16 %v261_v4, %v257_v3  ;;  %v635_v12 = vpack.c.bf16 %v247_v6, %v243_v1  ;;  %v251_v13 = vld [vmem:[#allocation7 + $0x210] sm:$0xff] }
  0x6b   :  { %620 = vmatpush1.bf16.msra.mxu0 %v619_v0  ;;  %v256_v10 = vld [vmem:[#allocation7 + $0x238] sm:$0xff]  ;;  %v581_v14 = vpack.c.bf16 %v270_v8, %v266_v7  ;;  %v265_v15 = vld [vmem:[#allocation7 + $0x280] sm:$0xff]  ;;  %v255_v18 = vld [vmem:[#allocation7 + $0x230] sm:$0xff] }
  0x6c   :  { %622 = vmatprep.subr.bf16.mxu0 %v621_v32  ;;  %v269_v16 = vld [vmem:[#allocation7 + $0x2a0] sm:$0xff]  ;;  %v637_v17 = vpack.c.bf16 %v256_v10, %v252_v9  ;;  %v274_v19 = vld [vmem:[#allocation7 + $0x2c8] sm:$0xff]  ;;  %v260_v21 = vld [vmem:[#allocation7 + $0x258] sm:$0xff]  ;;  %v639_v24 = vpack.c.bf16 %v255_v18, %v251_v13 }
  0x6d   :  { %568 = vmatpush1.bf16.msra.mxu1 %v567_v38  ;;  %v278_v20 = vld [vmem:[#allocation7 + $0x2e8] sm:$0xff]  ;;  %v264_v22 = vld [vmem:[#allocation7 + $0x278] sm:$0xff]  ;;  %v583_v23 = vpack.c.bf16 %v269_v16, %v265_v15  ;;  %v259_v25 = vld [vmem:[#allocation7 + $0x250] sm:$0xff] }
  0x6e   :  { %570 = vmatprep.subr.bf16.mxu1 %v569_v41  ;;  %v585_v26 = vpack.c.bf16 %v278_v20, %v274_v19  ;;  %v273_v27 = vld [vmem:[#allocation7 + $0x2c0] sm:$0xff]  ;;  %v641_v28 = vpack.c.bf16 %v264_v22, %v260_v21  ;;  %v263_v29 = vld [vmem:[#allocation7 + $0x270] sm:$0xff]  ;;  %v282_v30 = vld [vmem:[#allocation7 + $0x308] sm:$0xff] }
  0x6f   :  { %624 = vmatpush1.bf16.msra.mxu0 %v623_v39  ;;  %v277_v0 = vld [vmem:[#allocation7 + $0x2e0] sm:$0xff]  ;;  %v286_v31 = vld [vmem:[#allocation7 + $0x328] sm:$0xff]  ;;  %v268_v32 = vld [vmem:[#allocation7 + $0x298] sm:$0xff]  ;;  %v643_v35 = vpack.c.bf16 %v263_v29, %v259_v25 }
  0x70   :  { %626 = vmatprep.subr.bf16.mxu0 %v625_v44  ;;  %v272_v33 = vld [vmem:[#allocation7 + $0x2b8] sm:$0xff]  ;;  %v587_v34 = vpack.c.bf16 %v277_v0, %v273_v27  ;;  %v267_v36 = vld [vmem:[#allocation7 + $0x290] sm:$0xff]  ;;  %v589_v37 = vpack.c.bf16 %v286_v31, %v282_v30  ;;  %v281_v38 = vld [vmem:[#allocation7 + $0x300] sm:$0xff] }
  0x71   :  { %572 = vmatpush1.bf16.msra.mxu1 %v571_v50  ;;  %v285_v39 = vld [vmem:[#allocation7 + $0x320] sm:$0xff]  ;;  %v645_v40 = vpack.c.bf16 %v272_v33, %v268_v32  ;;  %v271_v41 = vld [vmem:[#allocation7 + $0x2b0] sm:$0xff]  ;;  %v290_v42 = vld [vmem:[#allocation7 + $0x348] sm:$0xff] }
  0x72   :  { %574 = vmatprep.subr.bf16.mxu1 %v573_v53  ;;  %v294_v43 = vld [vmem:[#allocation7 + $0x368] sm:$0xff]  ;;  %v276_v44 = vld [vmem:[#allocation7 + $0x2d8] sm:$0xff]  ;;  %v591_v46 = vpack.c.bf16 %v285_v39, %v281_v38  ;;  %v647_v47 = vpack.c.bf16 %v271_v41, %v267_v36  ;;  %v275_v48 = vld [vmem:[#allocation7 + $0x2d0] sm:$0xff] }
  0x73   :  { %628 = vmatpush1.bf16.msra.mxu0 %v627_v51  ;;  %v280_v45 = vld [vmem:[#allocation7 + $0x2f8] sm:$0xff]  ;;  %v593_v49 = vpack.c.bf16 %v294_v43, %v290_v42  ;;  %v289_v50 = vld [vmem:[#allocation7 + $0x340] sm:$0xff]  ;;  %v279_v53 = vld [vmem:[#allocation7 + $0x2f0] sm:$0xff] }
  0x74   :  { %630 = vmatprep.subr.bf16.mxu0 %v629_v56  ;;  %v293_v51 = vld [vmem:[#allocation7 + $0x360] sm:$0xff]  ;;  %v649_v52 = vpack.c.bf16 %v280_v45, %v276_v44  ;;  %v298_v54 = vld [vmem:[#allocation7 + $0x388] sm:$0xff]  ;;  %v284_v56 = vld [vmem:[#allocation7 + $0x318] sm:$0xff]  ;;  %v651_v59 = vpack.c.bf16 %v279_v53, %v275_v48 }
  0x75   :  { %576 = vmatpush1.bf16.msra.mxu1 %v575_v62  ;;  %v302_v55 = vld [vmem:[#allocation7 + $0x3a8] sm:$0xff]  ;;  %v288_v57 = vld [vmem:[#allocation7 + $0x338] sm:$0xff]  ;;  %v595_v58 = vpack.c.bf16 %v293_v51, %v289_v50  ;;  %v283_v60 = vld [vmem:[#allocation7 + $0x310] sm:$0xff] }
  0x76   :  { %578 = vmatprep.subr.bf16.mxu1 %v577_v2  ;;  %v597_v61 = vpack.c.bf16 %v302_v55, %v298_v54  ;;  %v297_v62 = vld [vmem:[#allocation7 + $0x380] sm:$0xff]  ;;  %v653_v1 = vpack.c.bf16 %v288_v57, %v284_v56  ;;  %v287_v2 = vld [vmem:[#allocation7 + $0x330] sm:$0xff]  ;;  %v306_v3 = vld [vmem:[#allocation7 + $0x3c8] sm:$0xff] }
  0x77   :  { %632 = vmatpush1.bf16.msra.mxu0 %v631_v63  ;;  %v301_v63 = vld [vmem:[#allocation7 + $0x3a0] sm:$0xff]  ;;  %v310_v4 = vld [vmem:[#allocation7 + $0x3e8] sm:$0xff]  ;;  %v296_v6 = vld [vmem:[#allocation7 + $0x378] sm:$0xff]  ;;  %v655_v8 = vpack.c.bf16 %v287_v2, %v283_v60 }
  0x78   :  { %634 = vmatprep.subr.bf16.mxu0 %v633_v5  ;;  %v292_v5 = vld [vmem:[#allocation7 + $0x358] sm:$0xff]  ;;  %v599_v7 = vpack.c.bf16 %v301_v63, %v297_v62  ;;  %v601_v9 = vpack.c.bf16 %v310_v4, %v306_v3  ;;  %v303_v18 = vld [vmem:[#allocation7 + $0x3b0] sm:$0xff]  ;;  %v314_v36 = vld [vmem:[#allocation8 + $0x8] sm:$0xff] }
  0x79   :  { %580 = vmatpush1.bf16.msra.mxu1 %v579_v11  ;;  %v657_v10 = vpack.c.bf16 %v296_v6, %v292_v5  ;;  %v291_v11 = vld [vmem:[#allocation7 + $0x350] sm:$0xff]  ;;  %v300_v13 = vld [vmem:[#allocation7 + $0x398] sm:$0xff]  ;;  %v318_v48 = vld [vmem:[#allocation8 + $0x28] sm:$0xff] }
  0x7a   :  { %582 = vmatprep.subr.bf16.mxu1 %v581_v14  ;;  %v304_v14 = vld [vmem:[#allocation7 + $0x3b8] sm:$0xff]  ;;  %v307_v25 = vld [vmem:[#allocation7 + $0x3d0] sm:$0xff]  ;;  %v322_v60 = vld [vmem:[#allocation8 + $0x48] sm:$0xff] }
  0x7b   :  { %636 = vmatpush1.bf16.msra.mxu0 %v635_v12  ;;  %v295_v12 = vld [vmem:[#allocation7 + $0x370] sm:$0xff]  ;;  %v661_v16 = vpack.c.bf16 %v304_v14, %v300_v13  ;;  %v308_v19 = vld [vmem:[#allocation7 + $0x3d8] sm:$0xff] }
  0x7c   :  { %638 = vmatprep.subr.bf16.mxu0 %v637_v17  ;;  %v659_v15 = vpack.c.bf16 %v295_v12, %v291_v11  ;;  %v299_v17 = vld [vmem:[#allocation7 + $0x390] sm:$0xff]  ;;  %v312_v20 = vld [vmem:[#allocation7 + $0x3f8] sm:$0xff] }
  0x7d   :  { %584 = vmatpush1.bf16.msra.mxu1 %v583_v23  ;;  %v663_v21 = vpack.c.bf16 %v303_v18, %v299_v17  ;;  %v665_v22 = vpack.c.bf16 %v312_v20, %v308_v19  ;;  %v305_v23 = vld [vmem:[#allocation7 + $0x3c0] sm:$0xff]  ;;  %v311_v27 = vld [vmem:[#allocation7 + $0x3f0] sm:$0xff] }
  0x7e   :  { %586 = vmatprep.subr.bf16.mxu1 %v585_v26  ;;  %v667_v0 = vpack.c.bf16 %v311_v27, %v307_v25 }
  0x7f   :  { %640 = vmatpush1.bf16.msra.mxu0 %v639_v24  ;;  %v309_v24 = vld [vmem:[#allocation7 + $0x3e0] sm:$0xff] }
  0x80   :  { %642 = vmatprep.subr.bf16.mxu0 %v641_v28  ;;  %v603_v26 = vpack.c.bf16 %v309_v24, %v305_v23 }
  0x81   :  { %588 = vmatpush1.bf16.msra.mxu1 %v587_v34  ;;  %v313_v34 = vld [vmem:[#allocation8] sm:$0xff] }
  0x82   :  { %590 = vmatprep.subr.bf16.mxu1 %v589_v37  ;;  %v316_v37 = vld [vmem:[#allocation8 + $0x18] sm:$0xff] }
  0x83   :  { %644 = vmatpush1.bf16.msra.mxu0 %v643_v35  ;;  %v315_v35 = vld [vmem:[#allocation8 + $0x10] sm:$0xff] }
  0x84   :  { %646 = vmatprep.subr.bf16.mxu0 %v645_v40 }
  0x85   :  { %592 = vmatpush1.bf16.msra.mxu1 %v591_v46  ;;  %v317_v46 = vld [vmem:[#allocation8 + $0x20] sm:$0xff] }
  0x86   :  { %594 = vmatprep.subr.bf16.mxu1 %v593_v49  ;;  %v320_v49 = vld [vmem:[#allocation8 + $0x38] sm:$0xff] }
  0x87   :  { %648 = vmatpush1.bf16.msra.mxu0 %v647_v47  ;;  %v319_v47 = vld [vmem:[#allocation8 + $0x30] sm:$0xff] }
  0x88   :  { %650 = vmatprep.subr.bf16.mxu0 %v649_v52 }
  0x89   :  { %596 = vmatpush1.bf16.msra.mxu1 %v595_v58  ;;  %v321_v58 = vld [vmem:[#allocation8 + $0x40] sm:$0xff] }
  0x8a   :  { %598 = vmatprep.subr.bf16.mxu1 %v597_v61  ;;  %v324_v61 = vld [vmem:[#allocation8 + $0x58] sm:$0xff] }
  0x8b   :  { %652 = vmatpush1.bf16.msra.mxu0 %v651_v59  ;;  %v323_v59 = vld [vmem:[#allocation8 + $0x50] sm:$0xff] }
  0x8c   :  { %654 = vmatprep.subr.bf16.mxu0 %v653_v1 }
  0x8d   :  { %600 = vmatpush1.bf16.msra.mxu1 %v599_v7 }
  0x8e   :  { %602 = vmatprep.subr.bf16.mxu1 %v601_v9 }
  0x8f   :  { %656 = vmatpush1.bf16.msra.mxu0 %v655_v8 }
  0x90   :  { %658 = vmatprep.subr.bf16.mxu0 %v657_v10 }
  0x91   :  { %604 = vmatpush1.bf16.msra.mxu1 %v603_v26 }
  0x93   :  { %660 = vmatpush1.bf16.msra.mxu0 %v659_v15 }
  0x94   :  { %662 = vmatprep.subr.bf16.mxu0 %v661_v16 }
  0x97   :  { %664 = vmatpush1.bf16.msra.mxu0 %v663_v21 }
  0x98   :  { %666 = vmatprep.subr.bf16.mxu0 %v665_v22 }
  0x9b   :  { %668 = vmatpush1.bf16.msra.mxu0 %v667_v0 }
 0x131   :  { %v168_v28 = vpop.f32.mrb[0].mxu0 }
 0x132   :  { %v170_v29 = vpop.f32.mrb[1].mxu0 }
 0x133   :  { %389 = vmatprep.mubr.f32.mxu1 %v170_v29  ;;  %472 = vmatprep.mubr.f32.mxu0 %v170_v29 }
 0x134   :  { %390 = vmatmul.mubr.f32.vlgmr.msra.gmra.mrb[0].mxu1 %v168_v28  ;;  %473 = vmatmul.mubr.f32.vlgmr.msra.gmra.mrb[6].mxu0 %v168_v28 }
 0x135   :  { %v174_v30 = vpop.f32.mrb[2].mxu0 }
 0x136   :  { %v176_v31 = vpop.f32.mrb[3].mxu0 }
 0x137   :  { %395 = vmatprep.mubr.f32.mxu1 %v176_v31  ;;  %478 = vmatprep.mubr.f32.mxu0 %v176_v31 }
 0x138   :  { %396 = vmatmul.mubr.f32.gmra.mrb[2].mxu1 %v174_v30  ;;  %479 = vmatmul.mubr.f32.gmra.mrb[8].mxu0 %v174_v30 }
 0x139   :  { %v180_v32 = vpop.f32.mrb[4].mxu0 }
 0x13a   :  { %v182_v33 = vpop.f32.mrb[5].mxu0 }
 0x13b   :  { %401 = vmatprep.mubr.f32.mxu1 %v182_v33  ;;  %484 = vmatprep.mubr.f32.mxu0 %v182_v33 }
 0x13c   :  { %402 = vmatmul.mubr.f32.gmra.mrb[4].mxu1 %v180_v32  ;;  %485 = vmatmul.mubr.f32.gmra.mrb[10].mxu0 %v180_v32 }
 0x207   :  { %v391_v38 = vpop.f32.mrb[0].mxu1  ;;  %v474_v39 = vpop.f32.mrb[6].mxu0 }
 0x208   :  { %v392_v40 = vadd.f32 %v391_v38, %v313_v34  ;;  %v475_v41 = vadd.f32 %v474_v39, %v315_v35  ;;  %v393_v42 = vpop.f32.mrb[1].mxu1  ;;  %v476_v43 = vpop.f32.mrb[7].mxu0 }
 0x209   :  { %v394_v44 = vadd.f32 %v393_v42, %v314_v36  ;;  %v477_v45 = vadd.f32 %v476_v43, %v316_v37 }
 0x20a   :  { %491 = vst [vmem:[#allocation10] sm:$0xff] %v392_v40  ;;  %493 = vst [vmem:[#allocation10 + $0x10] sm:$0xff] %v475_v41 }
 0x20b   :  { %492 = vst [vmem:[#allocation10 + $0x8] sm:$0xff] %v394_v44  ;;  %494 = vst [vmem:[#allocation10 + $0x18] sm:$0xff] %v477_v45  ;;  %v397_v50 = vpop.f32.mrb[2].mxu1  ;;  %v480_v51 = vpop.f32.mrb[8].mxu0 }
 0x20c   :  { %v398_v52 = vadd.f32 %v397_v50, %v317_v46  ;;  %v481_v53 = vadd.f32 %v480_v51, %v319_v47  ;;  %v399_v54 = vpop.f32.mrb[3].mxu1  ;;  %v482_v55 = vpop.f32.mrb[9].mxu0 }
 0x20d   :  { %v400_v56 = vadd.f32 %v399_v54, %v318_v48  ;;  %v483_v57 = vadd.f32 %v482_v55, %v320_v49 }
 0x20e   :  { %495 = vst [vmem:[#allocation10 + $0x20] sm:$0xff] %v398_v52  ;;  %497 = vst [vmem:[#allocation10 + $0x30] sm:$0xff] %v481_v53 }
 0x20f   :  { %496 = vst [vmem:[#allocation10 + $0x28] sm:$0xff] %v400_v56  ;;  %498 = vst [vmem:[#allocation10 + $0x38] sm:$0xff] %v483_v57  ;;  %v403_v62 = vpop.f32.mrb[4].mxu1  ;;  %v486_v63 = vpop.f32.mrb[10].mxu0 }
 0x210   :  { %v404_v1 = vadd.f32 %v403_v62, %v321_v58  ;;  %v487_v2 = vadd.f32 %v486_v63, %v323_v59  ;;  %v405_v3 = vpop.f32.mrb[5].mxu1  ;;  %v488_v4 = vpop.f32.mrb[11].mxu0 }
 0x211   :  { %v406_v5 = vadd.f32 %v405_v3, %v322_v60  ;;  %v489_v6 = vadd.f32 %v488_v4, %v324_v61 }
 0x212   :  { %499 = vst [vmem:[#allocation10 + $0x40] sm:$0xff] %v404_v1  ;;  %501 = vst [vmem:[#allocation10 + $0x50] sm:$0xff] %v487_v2 }
 0x213   :  { %500 = vst [vmem:[#allocation10 + $0x48] sm:$0xff] %v406_v5  ;;  %502 = vst [vmem:[#allocation10 + $0x58] sm:$0xff] %v489_v6 }
 0x214   :  { %780 = shalt.err (!%p777_p8)
}
 0x215   :  { %s781_s17 = scalar_lea.hbm %s915_s4, 1536 }
 0x216   :  { %p782_p9 = scmp.ne.s32.totalorder %s915_s4, %s781_s17  ;;  %p785_p10 = scmp.lt.u32.totalorder %s781_s17, %s915_s4 }
 0x218   :  { %p787_p11 = pnand %p785_p10, %p782_p9 }
 0x21a   :  { %790 = shalt.err (!%p787_p11)
}
 0x21b   :  { %514 = dma.vmem_to_hbm [thread:$0]  %s509_s13, 1536, %s915_s4, [#allocation4], %s806_s0, %s806_s0, %s807_s26  }
 0x21c   :  { %797 = dma.done.wait [#allocation4], 1536  }
 0x21d   :  { %798 = vsyncadd [#allocation4], 4294965760 }
 0x21e   :  { %518 = vsyncpa [#allocation3], 1 }
 0x21f   :  { %519 = vsyncpa [#allocation6], 1 }
 0x220   :  { %520 = vsyncpa [#allocation9], 1 }
 0x221   :  { %521 = vsyncpa [#allocation4], 1 }

// kernel: tpu_custom_call.1
= control target key start
LH: loop header
LB: loop body
LE: loop exit
PB: predicated region body
PF: predicated region fallthrough
CT: control target
= control target key end

     0   :  { %9 = vsyncpa [#allocation3], 0  ;;  %s911_s0 = inlined_call_operand.hbm [shape: f32[64,256], index: 0, kind: input, shape index: {}]   ;;  %s912_s1 = inlined_call_operand.hbm [shape: f32[24,64], index: 1, kind: input, shape index: {}]   ;;  %s913_s2 = inlined_call_operand.hbm [shape: f32[256,512], index: 2, kind: input, shape index: {}]   ;;  %s914_s3 = inlined_call_operand.hbm [shape: f32[24,512], index: 3, kind: input, shape index: {}]   ;;  %s915_s4 = inlined_call_operand.hbm [shape: f32[24,512], index: 4, kind: output, shape index: {}]  }
   0x1   :  { %10 = vsyncpa [#allocation6], 0 }
   0x2   :  { %11 = vsyncpa [#allocation9], 0 }
   0x3   :  { %12 = vsyncpa [#allocation4], 0  ;;  %s799_s15 = smov [#allocation5]   ;;  %s681_s19 = scalar_lea.hbm %s912_s1, 384 }
   0x4   :  { %s30_s16 = sshll.u32 %s799_s15, 4  ;;  %p682_p0 = scmp.ne.s32.totalorder %s912_s1, %s681_s19  ;;  %s31_s16 = int_to_ptr.vmem [resolvable:$true] %s30_s16 }
   0x5   :  { %p685_p1 = scmp.lt.u32.totalorder %s681_s19, %s912_s1 }
   0x7   :  { %p687_p2 = pnand %p685_p1, %p682_p0 }
   0x9   :  { %690 = shalt.err (!%p687_p2)
}
   0xa   :  { %s691_s24 = scalar_lea.vmem %s31_s16, 384  ;;  %p696_p4 = scmp.lt.s32.totalorder %s31_s16, %s31_s16 }
   0xb   :  { %p692_p3 = scmp.ne.s32.totalorder %s31_s16, %s691_s24  ;;  %p697_p5 = scmp.lt.s32.totalorder %s691_s24, %s691_s24 }
   0xd   :  { %p698_p6 = por %p697_p5, %p696_p4 }
   0xf   :  { %p699_p7 = pnand %p698_p6, %p692_p3 }
  0x11   :  { %702 = shalt.err (!%p699_p7)
}
  0x12   :  { %s800_s25 = smov 128   ;;  %s801_s26 = smov 8  }
  0x13   :  { %36 = dma.hbm_to_vmem [thread:$0]  %s912_s1, 384, %s31_s16, [#allocation6], %s800_s25, %s800_s25, %s801_s26  }
  0x14   :  { %s802_s29 = smov [#allocation2]   ;;  %s703_s7 = scalar_lea.hbm %s911_s0, 2048 }
  0x15   :  { %s18_s30 = sshll.u32 %s802_s29, 4  ;;  %p704_p8 = scmp.ne.s32.totalorder %s911_s0, %s703_s7  ;;  %s19_s30 = int_to_ptr.vmem [resolvable:$true] %s18_s30 }
  0x16   :  { %p707_p9 = scmp.lt.u32.totalorder %s703_s7, %s911_s0 }
  0x18   :  { %p709_p10 = pnand %p707_p9, %p704_p8 }
  0x1a   :  { %712 = shalt.err (!%p709_p10)
}
  0x1b   :  { %s713_s12 = scalar_lea.vmem %s19_s30, 2048  ;;  %p718_p12 = scmp.lt.s32.totalorder %s19_s30, %s19_s30 }
  0x1c   :  { %p714_p11 = scmp.ne.s32.totalorder %s19_s30, %s713_s12  ;;  %p719_p13 = scmp.lt.s32.totalorder %s713_s12, %s713_s12 }
  0x1e   :  { %p720_p0 = por %p719_p13, %p718_p12 }
  0x20   :  { %p721_p1 = pnand %p720_p0, %p714_p11 }
  0x22   :  { %724 = shalt.err (!%p721_p1)
}
  0x23   :  { %s803_s1 = smov 256   ;;  %s804_s13 = smov 16  }
  0x24   :  { %24 = dma.hbm_to_vmem [thread:$0]  %s911_s0, 2048, %s19_s30, [#allocation3], %s803_s1, %s803_s1, %s804_s13  }
  0x25   :  { %s805_s16 = smov [#allocation7]   ;;  %s725_s20 = scalar_lea.hbm %s913_s2, 16384 }
  0x26   :  { %s42_s17 = sshll.u32 %s805_s16, 4  ;;  %p726_p2 = scmp.ne.s32.totalorder %s913_s2, %s725_s20  ;;  %s43_s17 = int_to_ptr.vmem [resolvable:$true] %s42_s17 }
  0x27   :  { %p729_p3 = scmp.lt.u32.totalorder %s725_s20, %s913_s2 }
  0x29   :  { %p731_p4 = pnand %p729_p3, %p726_p2 }
  0x2b   :  { %734 = shalt.err (!%p731_p4)
}
  0x2c   :  { %s735_s25 = scalar_lea.vmem %s43_s17, 16384  ;;  %p740_p6 = scmp.lt.s32.totalorder %s43_s17, %s43_s17 }
  0x2d   :  { %p736_p5 = scmp.ne.s32.totalorder %s43_s17, %s735_s25  ;;  %p741_p7 = scmp.lt.s32.totalorder %s735_s25, %s735_s25 }
  0x2f   :  { %p742_p8 = por %p741_p7, %p740_p6 }
  0x31   :  { %p743_p9 = pnand %p742_p8, %p736_p5 }
  0x33   :  { %746 = shalt.err (!%p743_p9)
}
  0x34   :  { %s806_s0 = smov 512   ;;  %s807_s26 = smov 32  }
  0x35   :  { %48 = dma.hbm_to_vmem [thread:$0]  %s913_s2, 16384, %s43_s17, [#allocation6], %s806_s0, %s806_s0, %s807_s26  }
  0x36   :  { %s808_s29 = smov [#allocation8]   ;;  %s747_s7 = scalar_lea.hbm %s914_s3, 1536 }
  0x37   :  { %s54_s30 = sshll.u32 %s808_s29, 4  ;;  %p748_p10 = scmp.ne.s32.totalorder %s914_s3, %s747_s7  ;;  %s55_s30 = int_to_ptr.vmem [resolvable:$true] %s54_s30 }
  0x38   :  { %p751_p11 = scmp.lt.u32.totalorder %s747_s7, %s914_s3 }
  0x3a   :  { %p753_p12 = pnand %p751_p11, %p748_p10 }
  0x3c   :  { %756 = shalt.err (!%p753_p12)
}
  0x3d   :  { %s757_s12 = scalar_lea.vmem %s55_s30, 1536  ;;  %p762_p0 = scmp.lt.s32.totalorder %s55_s30, %s55_s30 }
  0x3e   :  { %p758_p13 = scmp.ne.s32.totalorder %s55_s30, %s757_s12  ;;  %p763_p1 = scmp.lt.s32.totalorder %s757_s12, %s757_s12 }
  0x40   :  { %p764_p2 = por %p763_p1, %p762_p0 }
  0x42   :  { %p765_p3 = pnand %p764_p2, %p758_p13 }
  0x44   :  { %768 = shalt.err (!%p765_p3)
}
  0x45   :  { %60 = dma.hbm_to_vmem [thread:$0]  %s914_s3, 1536, %s55_s30, [#allocation9], %s806_s0, %s806_s0, %s807_s26  }
  0x46   :  { %791 = dma.done.wait [#allocation3], 2048  }
  0x47   :  { %792 = vsyncadd [#allocation3], 4294965248 }
  0x48   :  { %793 = dma.done.wait [#allocation6], 16768  }
  0x49   :  { %794 = vsyncadd [#allocation6], 4294950528 }
  0x4a   :  { %795 = dma.done.wait [#allocation9], 1536  }
  0x4b   :  { %796 = vsyncadd [#allocation9], 4294965760  ;;  %v809_v0 = vmov 0.0   ;;  %v77_v1 = vld [vmem:[#allocation2 + $0x8] sm:$0xff]  ;;  %v79_v2 = vld [vmem:[#allocation2 + $0x18] sm:$0xff]  ;;  %vm92_vm0 = vcmask 523264  }
  0x4c   :  { %166 = vmatprep.mubr.f32.mxu0 %v809_v0  ;;  %v76_v3 = vld [vmem:[#allocation2] sm:$0xff]  ;;  %v525_v4 = vpack.c.bf16 %v79_v2, %v77_v1  ;;  %v78_v5 = vld [vmem:[#allocation2 + $0x10] sm:$0xff]  ;;  %v81_v6 = vld [vmem:[#allocation2 + $0x28] sm:$0xff]  ;;  %s810_s3 = smov [#allocation10]  }
  0x4d   :  { %v83_v7 = vld [vmem:[#allocation2 + $0x38] sm:$0xff]  ;;  %v527_v8 = vpack.c.bf16 %v78_v5, %v76_v3  ;;  %v80_v10 = vld [vmem:[#allocation2 + $0x20] sm:$0xff]  ;;  %v82_v11 = vld [vmem:[#allocation2 + $0x30] sm:$0xff]  ;;  %s508_s13 = sshll.u32 %s810_s3, 4  ;;  %s509_s13 = int_to_ptr.vmem [resolvable:$true] %s508_s13 }
  0x4e   :  { %v529_v9 = vpack.c.bf16 %v83_v7, %v81_v6  ;;  %v85_v12 = vld [vmem:[#allocation2 + $0x48] sm:$0xff]  ;;  %526 = vmatprep.subr.bf16.mxu0 %v525_v4  ;;  %v87_v13 = vld [vmem:[#allocation2 + $0x58] sm:$0xff]  ;;  %v531_v14 = vpack.c.bf16 %v82_v11, %v80_v10  ;;  %v84_v16 = vld [vmem:[#allocation2 + $0x40] sm:$0xff]  ;;  %s769_s14 = scalar_lea.vmem %s509_s13, 1536  ;;  %p774_p5 = scmp.lt.s32.totalorder %s509_s13, %s509_s13 }
  0x4f   :  { %528 = vmatpush1.bf16.msra.mxu0 %v527_v8  ;;  %v533_v15 = vpack.c.bf16 %v87_v13, %v85_v12  ;;  %v86_v17 = vld [vmem:[#allocation2 + $0x50] sm:$0xff]  ;;  %v89_v18 = vld [vmem:[#allocation2 + $0x68] sm:$0xff]  ;;  %v91_v19 = vld [vmem:[#allocation2 + $0x78] sm:$0xff]  ;;  %p770_p4 = scmp.ne.s32.totalorder %s509_s13, %s769_s14  ;;  %p775_p6 = scmp.lt.s32.totalorder %s769_s14, %s769_s14 }
  0x50   :  { %530 = vmatprep.subr.bf16.mxu0 %v529_v9  ;;  %v186_v20 = vld [vmem:[#allocation7 + $0x8] sm:$0xff]  ;;  %v185_v23 = vld [vmem:[#allocation7] sm:$0xff]  ;;  %v535_v24 = vpack.c.bf16 %v86_v17, %v84_v16  ;;  %v90_v26 = vld [vmem:[#allocation2 + $0x70] sm:$0xff]  ;;  %v537_v28 = vpack.c.bf16 %v91_v19, %v89_v18 }
  0x51   :  { %v190_v21 = vld [vmem:[#allocation7 + $0x28] sm:$0xff]  ;;  %v189_v27 = vld [vmem:[#allocation7 + $0x20] sm:$0xff]  ;;  %v188_v29 = vld [vmem:[#allocation7 + $0x18] sm:$0xff]  ;;  %p776_p7 = por %p775_p6, %p774_p5 }
  0x52   :  { %v541_v22 = vpack.c.bf16 %v190_v21, %v186_v20  ;;  %v88_v25 = vld [vmem:[#allocation2 + $0x60] sm:$0xff]  ;;  %v543_v30 = vpack.c.bf16 %v189_v27, %v185_v23  ;;  %v192_v33 = vld [vmem:[#allocation7 + $0x38] sm:$0xff]  ;;  %v193_v35 = vld [vmem:[#allocation7 + $0x40] sm:$0xff] }
  0x53   :  { %532 = vmatpush1.bf16.msra.mxu0 %v531_v14  ;;  %v194_v31 = vld [vmem:[#allocation7 + $0x48] sm:$0xff]  ;;  %v197_v36 = vld [vmem:[#allocation7 + $0x60] sm:$0xff]  ;;  %v539_v39 = vpack.c.bf16 %v90_v26, %v88_v25  ;;  %v187_v40 = vld [vmem:[#allocation7 + $0x10] sm:$0xff]  ;;  %v605_v43 = vpack.c.bf16 %v192_v33, %v188_v29  ;;  %p777_p8 = pnand %p776_p7, %p770_p4 }
  0x54   :  { %534 = vmatprep.subr.bf16.mxu0 %v533_v15  ;;  %542 = vmatprep.subr.bf16.mxu1 %v541_v22  ;;  %v198_v32 = vld [vmem:[#allocation7 + $0x68] sm:$0xff]  ;;  %v547_v37 = vpack.c.bf16 %v197_v36, %v193_v35  ;;  %v191_v41 = vld [vmem:[#allocation7 + $0x30] sm:$0xff]  ;;  %v196_v44 = vld [vmem:[#allocation7 + $0x58] sm:$0xff] }
  0x55   :  { %v545_v34 = vpack.c.bf16 %v198_v32, %v194_v31  ;;  %544 = vmatpush1.bf16.msra.mxu1 %v543_v30  ;;  %v202_v38 = vld [vmem:[#allocation7 + $0x88] sm:$0xff]  ;;  %v201_v46 = vld [vmem:[#allocation7 + $0x80] sm:$0xff]  ;;  %v200_v48 = vld [vmem:[#allocation7 + $0x78] sm:$0xff]  ;;  %v607_v53 = vpack.c.bf16 %v191_v41, %v187_v40 }
  0x56   :  { %v206_v42 = vld [vmem:[#allocation7 + $0xa8] sm:$0xff]  ;;  %v205_v47 = vld [vmem:[#allocation7 + $0xa0] sm:$0xff]  ;;  %v609_v56 = vpack.c.bf16 %v200_v48, %v196_v44  ;;  %v195_v57 = vld [vmem:[#allocation7 + $0x50] sm:$0xff] }
  0x57   :  { %536 = vmatpush1.bf16.msra.mxu0 %v535_v24  ;;  %546 = vmatprep.subr.bf16.mxu1 %v545_v34  ;;  %v549_v45 = vpack.c.bf16 %v206_v42, %v202_v38  ;;  %v210_v49 = vld [vmem:[#allocation7 + $0xc8] sm:$0xff]  ;;  %v551_v51 = vpack.c.bf16 %v205_v47, %v201_v46  ;;  %v209_v54 = vld [vmem:[#allocation7 + $0xc0] sm:$0xff]  ;;  %v199_v58 = vld [vmem:[#allocation7 + $0x70] sm:$0xff] }
  0x58   :  { %538 = vmatprep.subr.bf16.mxu0 %v537_v28  ;;  %v214_v50 = vld [vmem:[#allocation7 + $0xe8] sm:$0xff]  ;;  %v213_v55 = vld [vmem:[#allocation7 + $0xe0] sm:$0xff]  ;;  %v204_v59 = vld [vmem:[#allocation7 + $0x98] sm:$0xff]  ;;  %v611_v3 = vpack.c.bf16 %v199_v58, %v195_v57 }
  0x59   :  { %548 = vmatpush1.bf16.msra.mxu1 %v547_v37  ;;  %v73_v52 = vld [vmem:[#allocation5] sm:$0xff]  ;;  %v553_v60 = vpack.c.bf16 %v214_v50, %v210_v49  ;;  %v208_v61 = vld [vmem:[#allocation7 + $0xb8] sm:$0xff]  ;;  %v74_v1 = vld [vmem:[#allocation5 + $0x8] sm:$0xff]  ;;  %v555_v2 = vpack.c.bf16 %v213_v55, %v209_v54 }
  0x5a   :  { %550 = vmatprep.subr.bf16.mxu1 %v549_v45  ;;  %v218_v62 = vld [vmem:[#allocation7 + $0x108] sm:$0xff]  ;;  %v203_v4 = vld [vmem:[#allocation7 + $0x90] sm:$0xff]  ;;  %v217_v5 = vld [vmem:[#allocation7 + $0x100] sm:$0xff]  ;;  %v613_v7 = vpack.c.bf16 %v208_v61, %v204_v59 }
  0x5b   :  { %540 = vmatpush1.bf16.msra.mxu0 %v539_v39  ;;  %v222_v63 = vld [vmem:[#allocation7 + $0x128] sm:$0xff]  ;;  %v221_v6 = vld [vmem:[#allocation7 + $0x120] sm:$0xff]  ;;  %v207_v8 = vld [vmem:[#allocation7 + $0xb0] sm:$0xff] }
  0x5c   :  { %606 = vmatprep.subr.bf16.mxu0 %v605_v43  ;;  %v557_v9 = vpack.c.bf16 %v222_v63, %v218_v62  ;;  %v226_v10 = vld [vmem:[#allocation7 + $0x148] sm:$0xff]  ;;  %v212_v12 = vld [vmem:[#allocation7 + $0xd8] sm:$0xff]  ;;  %v559_v15 = vpack.c.bf16 %v221_v6, %v217_v5  ;;  %v615_v16 = vpack.c.bf16 %v207_v8, %v203_v4  ;;  %v211_v17 = vld [vmem:[#allocation7 + $0xd0] sm:$0xff] }
  0x5d   :  { %552 = vmatpush1.bf16.msra.mxu1 %v551_v51  ;;  %v230_v11 = vld [vmem:[#allocation7 + $0x168] sm:$0xff]  ;;  %v216_v13 = vld [vmem:[#allocation7 + $0xf8] sm:$0xff]  ;;  %v225_v19 = vld [vmem:[#allocation7 + $0x140] sm:$0xff] }
  0x5e   :  { %522 = vmatmul.mubr.msk.f32.vlgmr.msra.gmra.mrb[0].mxu0 %vm92_vm0, %v73_v52  ;;  %554 = vmatprep.subr.bf16.mxu1 %v553_v60  ;;  %v75_v14 = vld [vmem:[#allocation5 + $0x10] sm:$0xff]  ;;  %v561_v18 = vpack.c.bf16 %v230_v11, %v226_v10  ;;  %v229_v20 = vld [vmem:[#allocation7 + $0x160] sm:$0xff]  ;;  %v617_v21 = vpack.c.bf16 %v216_v13, %v212_v12  ;;  %v215_v22 = vld [vmem:[#allocation7 + $0xf0] sm:$0xff] }
  0x5f   :  { %172 = vmatprep.mubr.f32.mxu0 %v809_v0  ;;  %608 = vmatpush1.bf16.msra.mxu0 %v607_v53  ;;  %v234_v23 = vld [vmem:[#allocation7 + $0x188] sm:$0xff]  ;;  %v220_v25 = vld [vmem:[#allocation7 + $0x118] sm:$0xff]  ;;  %v563_v27 = vpack.c.bf16 %v229_v20, %v225_v19  ;;  %v219_v28 = vld [vmem:[#allocation7 + $0x110] sm:$0xff] }
  0x60   :  { %610 = vmatprep.subr.bf16.mxu0 %v609_v56  ;;  %v238_v24 = vld [vmem:[#allocation7 + $0x1a8] sm:$0xff]  ;;  %v224_v26 = vld [vmem:[#allocation7 + $0x138] sm:$0xff]  ;;  %v233_v30 = vld [vmem:[#allocation7 + $0x180] sm:$0xff] }
  0x61   :  { %556 = vmatpush1.bf16.msra.mxu1 %v555_v2  ;;  %v565_v29 = vpack.c.bf16 %v238_v24, %v234_v23  ;;  %v237_v31 = vld [vmem:[#allocation7 + $0x1a0] sm:$0xff]  ;;  %v621_v32 = vpack.c.bf16 %v224_v26, %v220_v25  ;;  %v223_v33 = vld [vmem:[#allocation7 + $0x130] sm:$0xff]  ;;  %v242_v34 = vld [vmem:[#allocation7 + $0x1c8] sm:$0xff] }
  0x62   :  { %523 = vmatmul.mubr.msk.f32.gmra.mrb[2].mxu0 %vm92_vm0, %v74_v1  ;;  %558 = vmatprep.subr.bf16.mxu1 %v557_v9  ;;  %v246_v35 = vld [vmem:[#allocation7 + $0x1e8] sm:$0xff]  ;;  %v228_v36 = vld [vmem:[#allocation7 + $0x158] sm:$0xff]  ;;  %v567_v38 = vpack.c.bf16 %v237_v31, %v233_v30  ;;  %v623_v39 = vpack.c.bf16 %v223_v33, %v219_v28  ;;  %v227_v40 = vld [vmem:[#allocation7 + $0x150] sm:$0xff] }
  0x63   :  { %178 = vmatprep.mubr.f32.mxu0 %v809_v0  ;;  %612 = vmatpush1.bf16.msra.mxu0 %v611_v3  ;;  %v619_v0 = vpack.c.bf16 %v215_v22, %v211_v17  ;;  %v232_v37 = vld [vmem:[#allocation7 + $0x178] sm:$0xff]  ;;  %v569_v41 = vpack.c.bf16 %v246_v35, %v242_v34  ;;  %v241_v42 = vld [vmem:[#allocation7 + $0x1c0] sm:$0xff]  ;;  %v231_v45 = vld [vmem:[#allocation7 + $0x170] sm:$0xff] }
  0x64   :  { %614 = vmatprep.subr.bf16.mxu0 %v613_v7  ;;  %v245_v43 = vld [vmem:[#allocation7 + $0x1e0] sm:$0xff]  ;;  %v625_v44 = vpack.c.bf16 %v232_v37, %v228_v36  ;;  %v250_v46 = vld [vmem:[#allocation7 + $0x208] sm:$0xff]  ;;  %v236_v48 = vld [vmem:[#allocation7 + $0x198] sm:$0xff]  ;;  %v627_v51 = vpack.c.bf16 %v231_v45, %v227_v40 }
  0x65   :  { %560 = vmatpush1.bf16.msra.mxu1 %v559_v15  ;;  %v254_v47 = vld [vmem:[#allocation7 + $0x228] sm:$0xff]  ;;  %v240_v49 = vld [vmem:[#allocation7 + $0x1b8] sm:$0xff]  ;;  %v571_v50 = vpack.c.bf16 %v245_v43, %v241_v42  ;;  %v235_v52 = vld [vmem:[#allocation7 + $0x190] sm:$0xff] }
  0x66   :  { %524 = vmatmul.mubr.msk.f32.gmra.mrb[4].mxu0 %vm92_vm0, %v75_v14  ;;  %562 = vmatprep.subr.bf16.mxu1 %v561_v18  ;;  %v573_v53 = vpack.c.bf16 %v254_v47, %v250_v46  ;;  %v249_v54 = vld [vmem:[#allocation7 + $0x200] sm:$0xff]  ;;  %v629_v56 = vpack.c.bf16 %v240_v49, %v236_v48  ;;  %v239_v57 = vld [vmem:[#allocation7 + $0x1b0] sm:$0xff]  ;;  %v258_v58 = vld [vmem:[#allocation7 + $0x248] sm:$0xff] }
  0x67   :  { %616 = vmatpush1.bf16.msra.mxu0 %v615_v16  ;;  %v253_v55 = vld [vmem:[#allocation7 + $0x220] sm:$0xff]  ;;  %v262_v59 = vld [vmem:[#allocation7 + $0x268] sm:$0xff]  ;;  %v244_v60 = vld [vmem:[#allocation7 + $0x1d8] sm:$0xff]  ;;  %v631_v63 = vpack.c.bf16 %v239_v57, %v235_v52 }
  0x68   :  { %618 = vmatprep.subr.bf16.mxu0 %v617_v21  ;;  %v248_v61 = vld [vmem:[#allocation7 + $0x1f8] sm:$0xff]  ;;  %v575_v62 = vpack.c.bf16 %v253_v55, %v249_v54  ;;  %v243_v1 = vld [vmem:[#allocation7 + $0x1d0] sm:$0xff]  ;;  %v577_v2 = vpack.c.bf16 %v262_v59, %v258_v58  ;;  %v257_v3 = vld [vmem:[#allocation7 + $0x240] sm:$0xff] }
  0x69   :  { %564 = vmatpush1.bf16.msra.mxu1 %v563_v27  ;;  %v261_v4 = vld [vmem:[#allocation7 + $0x260] sm:$0xff]  ;;  %v633_v5 = vpack.c.bf16 %v248_v61, %v244_v60  ;;  %v247_v6 = vld [vmem:[#allocation7 + $0x1f0] sm:$0xff]  ;;  %v266_v7 = vld [vmem:[#allocation7 + $0x288] sm:$0xff] }
  0x6a   :  { %566 = vmatprep.subr.bf16.mxu1 %v565_v29  ;;  %v270_v8 = vld [vmem:[#allocation7 + $0x2a8] sm:$0xff]  ;;  %v252_v9 = vld [vmem:[#allocation7 + $0x218] sm:$0xff]  ;;  %v579_v11 = vpack.c.bf16 %v261_v4, %v257_v3  ;;  %v635_v12 = vpack.c.bf16 %v247_v6, %v243_v1  ;;  %v251_v13 = vld [vmem:[#allocation7 + $0x210] sm:$0xff] }
  0x6b   :  { %620 = vmatpush1.bf16.msra.mxu0 %v619_v0  ;;  %v256_v10 = vld [vmem:[#allocation7 + $0x238] sm:$0xff]  ;;  %v581_v14 = vpack.c.bf16 %v270_v8, %v266_v7  ;;  %v265_v15 = vld [vmem:[#allocation7 + $0x280] sm:$0xff]  ;;  %v255_v18 = vld [vmem:[#allocation7 + $0x230] sm:$0xff] }
  0x6c   :  { %622 = vmatprep.subr.bf16.mxu0 %v621_v32  ;;  %v269_v16 = vld [vmem:[#allocation7 + $0x2a0] sm:$0xff]  ;;  %v637_v17 = vpack.c.bf16 %v256_v10, %v252_v9  ;;  %v274_v19 = vld [vmem:[#allocation7 + $0x2c8] sm:$0xff]  ;;  %v260_v21 = vld [vmem:[#allocation7 + $0x258] sm:$0xff]  ;;  %v639_v24 = vpack.c.bf16 %v255_v18, %v251_v13 }
  0x6d   :  { %568 = vmatpush1.bf16.msra.mxu1 %v567_v38  ;;  %v278_v20 = vld [vmem:[#allocation7 + $0x2e8] sm:$0xff]  ;;  %v264_v22 = vld [vmem:[#allocation7 + $0x278] sm:$0xff]  ;;  %v583_v23 = vpack.c.bf16 %v269_v16, %v265_v15  ;;  %v259_v25 = vld [vmem:[#allocation7 + $0x250] sm:$0xff] }
  0x6e   :  { %570 = vmatprep.subr.bf16.mxu1 %v569_v41  ;;  %v585_v26 = vpack.c.bf16 %v278_v20, %v274_v19  ;;  %v273_v27 = vld [vmem:[#allocation7 + $0x2c0] sm:$0xff]  ;;  %v641_v28 = vpack.c.bf16 %v264_v22, %v260_v21  ;;  %v263_v29 = vld [vmem:[#allocation7 + $0x270] sm:$0xff]  ;;  %v282_v30 = vld [vmem:[#allocation7 + $0x308] sm:$0xff] }
  0x6f   :  { %624 = vmatpush1.bf16.msra.mxu0 %v623_v39  ;;  %v277_v0 = vld [vmem:[#allocation7 + $0x2e0] sm:$0xff]  ;;  %v286_v31 = vld [vmem:[#allocation7 + $0x328] sm:$0xff]  ;;  %v268_v32 = vld [vmem:[#allocation7 + $0x298] sm:$0xff]  ;;  %v643_v35 = vpack.c.bf16 %v263_v29, %v259_v25 }
  0x70   :  { %626 = vmatprep.subr.bf16.mxu0 %v625_v44  ;;  %v272_v33 = vld [vmem:[#allocation7 + $0x2b8] sm:$0xff]  ;;  %v587_v34 = vpack.c.bf16 %v277_v0, %v273_v27  ;;  %v267_v36 = vld [vmem:[#allocation7 + $0x290] sm:$0xff]  ;;  %v589_v37 = vpack.c.bf16 %v286_v31, %v282_v30  ;;  %v281_v38 = vld [vmem:[#allocation7 + $0x300] sm:$0xff] }
  0x71   :  { %572 = vmatpush1.bf16.msra.mxu1 %v571_v50  ;;  %v285_v39 = vld [vmem:[#allocation7 + $0x320] sm:$0xff]  ;;  %v645_v40 = vpack.c.bf16 %v272_v33, %v268_v32  ;;  %v271_v41 = vld [vmem:[#allocation7 + $0x2b0] sm:$0xff]  ;;  %v290_v42 = vld [vmem:[#allocation7 + $0x348] sm:$0xff] }
  0x72   :  { %574 = vmatprep.subr.bf16.mxu1 %v573_v53  ;;  %v294_v43 = vld [vmem:[#allocation7 + $0x368] sm:$0xff]  ;;  %v276_v44 = vld [vmem:[#allocation7 + $0x2d8] sm:$0xff]  ;;  %v591_v46 = vpack.c.bf16 %v285_v39, %v281_v38  ;;  %v647_v47 = vpack.c.bf16 %v271_v41, %v267_v36  ;;  %v275_v48 = vld [vmem:[#allocation7 + $0x2d0] sm:$0xff] }
  0x73   :  { %628 = vmatpush1.bf16.msra.mxu0 %v627_v51  ;;  %v280_v45 = vld [vmem:[#allocation7 + $0x2f8] sm:$0xff]  ;;  %v593_v49 = vpack.c.bf16 %v294_v43, %v290_v42  ;;  %v289_v50 = vld [vmem:[#allocation7 + $0x340] sm:$0xff]  ;;  %v279_v53 = vld [vmem:[#allocation7 + $0x2f0] sm:$0xff] }
  0x74   :  { %630 = vmatprep.subr.bf16.mxu0 %v629_v56  ;;  %v293_v51 = vld [vmem:[#allocation7 + $0x360] sm:$0xff]  ;;  %v649_v52 = vpack.c.bf16 %v280_v45, %v276_v44  ;;  %v298_v54 = vld [vmem:[#allocation7 + $0x388] sm:$0xff]  ;;  %v284_v56 = vld [vmem:[#allocation7 + $0x318] sm:$0xff]  ;;  %v651_v59 = vpack.c.bf16 %v279_v53, %v275_v48 }
  0x75   :  { %576 = vmatpush1.bf16.msra.mxu1 %v575_v62  ;;  %v302_v55 = vld [vmem:[#allocation7 + $0x3a8] sm:$0xff]  ;;  %v288_v57 = vld [vmem:[#allocation7 + $0x338] sm:$0xff]  ;;  %v595_v58 = vpack.c.bf16 %v293_v51, %v289_v50  ;;  %v283_v60 = vld [vmem:[#allocation7 + $0x310] sm:$0xff] }
  0x76   :  { %578 = vmatprep.subr.bf16.mxu1 %v577_v2  ;;  %v597_v61 = vpack.c.bf16 %v302_v55, %v298_v54  ;;  %v297_v62 = vld [vmem:[#allocation7 + $0x380] sm:$0xff]  ;;  %v653_v1 = vpack.c.bf16 %v288_v57, %v284_v56  ;;  %v287_v2 = vld [vmem:[#allocation7 + $0x330] sm:$0xff]  ;;  %v306_v3 = vld [vmem:[#allocation7 + $0x3c8] sm:$0xff] }
  0x77   :  { %632 = vmatpush1.bf16.msra.mxu0 %v631_v63  ;;  %v301_v63 = vld [vmem:[#allocation7 + $0x3a0] sm:$0xff]  ;;  %v310_v4 = vld [vmem:[#allocation7 + $0x3e8] sm:$0xff]  ;;  %v296_v6 = vld [vmem:[#allocation7 + $0x378] sm:$0xff]  ;;  %v655_v8 = vpack.c.bf16 %v287_v2, %v283_v60 }
  0x78   :  { %634 = vmatprep.subr.bf16.mxu0 %v633_v5  ;;  %v292_v5 = vld [vmem:[#allocation7 + $0x358] sm:$0xff]  ;;  %v599_v7 = vpack.c.bf16 %v301_v63, %v297_v62  ;;  %v601_v9 = vpack.c.bf16 %v310_v4, %v306_v3  ;;  %v303_v18 = vld [vmem:[#allocation7 + $0x3b0] sm:$0xff]  ;;  %v314_v36 = vld [vmem:[#allocation8 + $0x8] sm:$0xff] }
  0x79   :  { %580 = vmatpush1.bf16.msra.mxu1 %v579_v11  ;;  %v657_v10 = vpack.c.bf16 %v296_v6, %v292_v5  ;;  %v291_v11 = vld [vmem:[#allocation7 + $0x350] sm:$0xff]  ;;  %v300_v13 = vld [vmem:[#allocation7 + $0x398] sm:$0xff]  ;;  %v318_v48 = vld [vmem:[#allocation8 + $0x28] sm:$0xff] }
  0x7a   :  { %582 = vmatprep.subr.bf16.mxu1 %v581_v14  ;;  %v304_v14 = vld [vmem:[#allocation7 + $0x3b8] sm:$0xff]  ;;  %v307_v25 = vld [vmem:[#allocation7 + $0x3d0] sm:$0xff]  ;;  %v322_v60 = vld [vmem:[#allocation8 + $0x48] sm:$0xff] }
  0x7b   :  { %636 = vmatpush1.bf16.msra.mxu0 %v635_v12  ;;  %v295_v12 = vld [vmem:[#allocation7 + $0x370] sm:$0xff]  ;;  %v661_v16 = vpack.c.bf16 %v304_v14, %v300_v13  ;;  %v308_v19 = vld [vmem:[#allocation7 + $0x3d8] sm:$0xff] }
  0x7c   :  { %638 = vmatprep.subr.bf16.mxu0 %v637_v17  ;;  %v659_v15 = vpack.c.bf16 %v295_v12, %v291_v11  ;;  %v299_v17 = vld [vmem:[#allocation7 + $0x390] sm:$0xff]  ;;  %v312_v20 = vld [vmem:[#allocation7 + $0x3f8] sm:$0xff] }
  0x7d   :  { %584 = vmatpush1.bf16.msra.mxu1 %v583_v23  ;;  %v663_v21 = vpack.c.bf16 %v303_v18, %v299_v17  ;;  %v665_v22 = vpack.c.bf16 %v312_v20, %v308_v19  ;;  %v305_v23 = vld [vmem:[#allocation7 + $0x3c0] sm:$0xff]  ;;  %v311_v27 = vld [vmem:[#allocation7 + $0x3f0] sm:$0xff] }
  0x7e   :  { %586 = vmatprep.subr.bf16.mxu1 %v585_v26  ;;  %v667_v0 = vpack.c.bf16 %v311_v27, %v307_v25 }
  0x7f   :  { %640 = vmatpush1.bf16.msra.mxu0 %v639_v24  ;;  %v309_v24 = vld [vmem:[#allocation7 + $0x3e0] sm:$0xff] }
  0x80   :  { %642 = vmatprep.subr.bf16.mxu0 %v641_v28  ;;  %v603_v26 = vpack.c.bf16 %v309_v24, %v305_v23 }
  0x81   :  { %588 = vmatpush1.bf16.msra.mxu1 %v587_v34  ;;  %v313_v34 = vld [vmem:[#allocation8] sm:$0xff] }
  0x82   :  { %590 = vmatprep.subr.bf16.mxu1 %v589_v37  ;;  %v316_v37 = vld [vmem:[#allocation8 + $0x18] sm:$0xff] }
  0x83   :  { %644 = vmatpush1.bf16.msra.mxu0 %v643_v35  ;;  %v315_v35 = vld [vmem:[#allocation8 + $0x10] sm:$0xff] }
  0x84   :  { %646 = vmatprep.subr.bf16.mxu0 %v645_v40 }
  0x85   :  { %592 = vmatpush1.bf16.msra.mxu1 %v591_v46  ;;  %v317_v46 = vld [vmem:[#allocation8 + $0x20] sm:$0xff] }
  0x86   :  { %594 = vmatprep.subr.bf16.mxu1 %v593_v49  ;;  %v320_v49 = vld [vmem:[#allocation8 + $0x38] sm:$0xff] }
  0x87   :  { %648 = vmatpush1.bf16.msra.mxu0 %v647_v47  ;;  %v319_v47 = vld [vmem:[#allocation8 + $0x30] sm:$0xff] }
  0x88   :  { %650 = vmatprep.subr.bf16.mxu0 %v649_v52 }
  0x89   :  { %596 = vmatpush1.bf16.msra.mxu1 %v595_v58  ;;  %v321_v58 = vld [vmem:[#allocation8 + $0x40] sm:$0xff] }
  0x8a   :  { %598 = vmatprep.subr.bf16.mxu1 %v597_v61  ;;  %v324_v61 = vld [vmem:[#allocation8 + $0x58] sm:$0xff] }
  0x8b   :  { %652 = vmatpush1.bf16.msra.mxu0 %v651_v59  ;;  %v323_v59 = vld [vmem:[#allocation8 + $0x50] sm:$0xff] }
  0x8c   :  { %654 = vmatprep.subr.bf16.mxu0 %v653_v1 }
  0x8d   :  { %600 = vmatpush1.bf16.msra.mxu1 %v599_v7 }
  0x8e   :  { %602 = vmatprep.subr.bf16.mxu1 %v601_v9 }
  0x8f   :  { %656 = vmatpush1.bf16.msra.mxu0 %v655_v8 }
  0x90   :  { %658 = vmatprep.subr.bf16.mxu0 %v657_v10 }
  0x91   :  { %604 = vmatpush1.bf16.msra.mxu1 %v603_v26 }
  0x93   :  { %660 = vmatpush1.bf16.msra.mxu0 %v659_v15 }
  0x94   :  { %662 = vmatprep.subr.bf16.mxu0 %v661_v16 }
  0x97   :  { %664 = vmatpush1.bf16.msra.mxu0 %v663_v21 }
  0x98   :  { %666 = vmatprep.subr.bf16.mxu0 %v665_v22 }
  0x9b   :  { %668 = vmatpush1.bf16.msra.mxu0 %v667_v0 }
 0x131   :  { %v168_v28 = vpop.f32.mrb[0].mxu0 }
 0x132   :  { %v170_v29 = vpop.f32.mrb[1].mxu0 }
 0x133   :  { %389 = vmatprep.mubr.f32.mxu1 %v170_v29  ;;  %472 = vmatprep.mubr.f32.mxu0 %v170_v29 }
 0x134   :  { %390 = vmatmul.mubr.f32.vlgmr.msra.gmra.mrb[0].mxu1 %v168_v28  ;;  %473 = vmatmul.mubr.f32.vlgmr.msra.gmra.mrb[6].mxu0 %v168_v28 }
 0x135   :  { %v174_v30 = vpop.f32.mrb[2].mxu0 }
 0x136   :  { %v176_v31 = vpop.f32.mrb[3].mxu0 }
 0x137   :  { %395 = vmatprep.mubr.f32.mxu1 %v176_v31  ;;  %478 = vmatprep.mubr.f32.mxu0 %v176_v31 }
 0x138   :  { %396 = vmatmul.mubr.f32.gmra.mrb[2].mxu1 %v174_v30  ;;  %479 = vmatmul.mubr.f32.gmra.mrb[8].mxu0 %v174_v30 }
 0x139   :  { %v180_v32 = vpop.f32.mrb[4].mxu0 }
 0x13a   :  { %v182_v33 = vpop.f32.mrb[5].mxu0 }
 0x13b   :  { %401 = vmatprep.mubr.f32.mxu1 %v182_v33  ;;  %484 = vmatprep.mubr.f32.mxu0 %v182_v33 }
 0x13c   :  { %402 = vmatmul.mubr.f32.gmra.mrb[4].mxu1 %v180_v32  ;;  %485 = vmatmul.mubr.f32.gmra.mrb[10].mxu0 %v180_v32 }
 0x207   :  { %v391_v38 = vpop.f32.mrb[0].mxu1  ;;  %v474_v39 = vpop.f32.mrb[6].mxu0 }
 0x208   :  { %v392_v40 = vadd.f32 %v391_v38, %v313_v34  ;;  %v475_v41 = vadd.f32 %v474_v39, %v315_v35  ;;  %v393_v42 = vpop.f32.mrb[1].mxu1  ;;  %v476_v43 = vpop.f32.mrb[7].mxu0 }
 0x209   :  { %v394_v44 = vadd.f32 %v393_v42, %v314_v36  ;;  %v477_v45 = vadd.f32 %v476_v43, %v316_v37 }
 0x20a   :  { %491 = vst [vmem:[#allocation10] sm:$0xff] %v392_v40  ;;  %493 = vst [vmem:[#allocation10 + $0x10] sm:$0xff] %v475_v41 }
 0x20b   :  { %492 = vst [vmem:[#allocation10 + $0x8] sm:$0xff] %v394_v44  ;;  %494 = vst [vmem:[#allocation10 + $0x18] sm:$0xff] %v477_v45  ;;  %v397_v50 = vpop.f32.mrb[2].mxu1  ;;  %v480_v51 = vpop.f32.mrb[8].mxu0 }
 0x20c   :  { %v398_v52 = vadd.f32 %v397_v50, %v317_v46  ;;  %v481_v53 = vadd.f32 %v480_v51, %v319_v47  ;;  %v399_v54 = vpop.f32.mrb[3].mxu1  ;;  %v482_v55 = vpop.f32.mrb[9].mxu0 }
 0x20d   :  { %v400_v56 = vadd.f32 %v399_v54, %v318_v48  ;;  %v483_v57 = vadd.f32 %v482_v55, %v320_v49 }
 0x20e   :  { %495 = vst [vmem:[#allocation10 + $0x20] sm:$0xff] %v398_v52  ;;  %497 = vst [vmem:[#allocation10 + $0x30] sm:$0xff] %v481_v53 }
 0x20f   :  { %496 = vst [vmem:[#allocation10 + $0x28] sm:$0xff] %v400_v56  ;;  %498 = vst [vmem:[#allocation10 + $0x38] sm:$0xff] %v483_v57  ;;  %v403_v62 = vpop.f32.mrb[4].mxu1  ;;  %v486_v63 = vpop.f32.mrb[10].mxu0 }
 0x210   :  { %v404_v1 = vadd.f32 %v403_v62, %v321_v58  ;;  %v487_v2 = vadd.f32 %v486_v63, %v323_v59  ;;  %v405_v3 = vpop.f32.mrb[5].mxu1  ;;  %v488_v4 = vpop.f32.mrb[11].mxu0 }
 0x211   :  { %v406_v5 = vadd.f32 %v405_v3, %v322_v60  ;;  %v489_v6 = vadd.f32 %v488_v4, %v324_v61 }
 0x212   :  { %499 = vst [vmem:[#allocation10 + $0x40] sm:$0xff] %v404_v1  ;;  %501 = vst [vmem:[#allocation10 + $0x50] sm:$0xff] %v487_v2 }
 0x213   :  { %500 = vst [vmem:[#allocation10 + $0x48] sm:$0xff] %v406_v5  ;;  %502 = vst [vmem:[#allocation10 + $0x58] sm:$0xff] %v489_v6 }
 0x214   :  { %780 = shalt.err (!%p777_p8)
}
 0x215   :  { %s781_s17 = scalar_lea.hbm %s915_s4, 1536 }
 0x216   :  { %p782_p9 = scmp.ne.s32.totalorder %s915_s4, %s781_s17  ;;  %p785_p10 = scmp.lt.u32.totalorder %s781_s17, %s915_s4 }
 0x218   :  { %p787_p11 = pnand %p785_p10, %p782_p9 }
 0x21a   :  { %790 = shalt.err (!%p787_p11)
}
 0x21b   :  { %514 = dma.vmem_to_hbm [thread:$0]  %s509_s13, 1536, %s915_s4, [#allocation4], %s806_s0, %s806_s0, %s807_s26  }
 0x21c   :  { %797 = dma.done.wait [#allocation4], 1536  }
 0x21d   :  { %798 = vsyncadd [#allocation4], 4294965760 }
 0x21e   :  { %518 = vsyncpa [#allocation3], 1 }
 0x21f   :  { %519 = vsyncpa [#allocation6], 1 }
 0x220   :  { %520 = vsyncpa [#allocation9], 1 }
 0x221   :  { %521 = vsyncpa [#allocation4], 1 }

</bundles_post_ra>
